<compile_context>
chip_gen: v6e
topology: v6e:2x2x1
jax: 0.10.0
libtpu: 0.0.40
codegen_flags: <defaults>
</compile_context>

<pallas_src>
import jax
import jax.numpy as jnp
from jax import lax
from jax.experimental import pallas as pl
from jax.experimental.pallas import tpu as pltpu


# ---------------------------------------------------------------------------
# VMEM / tile sizing
# ---------------------------------------------------------------------------
def _vmem_budget():
    """Returns (per-step double-buffered footprint budget, vmem_limit_bytes)."""
    try:
        phys = int(pltpu.get_tpu_info().vmem_capacity_bytes)
    except Exception:
        phys = 64 << 20  # conservative fallback: v7x per-TensorCore VMEM
    # Leave >half of physical VMEM for the second pipeline generation, compiler
    # scratch and regalloc slack.  ~21 MiB on v7x (64 MiB), 24 MiB on v5e/v6e.
    budget = min(phys // 3, 24 << 20)
    # Raise the scoped VMEM limit above the 16/32 MiB defaults (v5e/v6e) while
    # staying well inside physical VMEM on every generation.
    limit = max(min(phys - (16 << 20), 100 << 20), 32 << 20)
    return budget, limit


def _pick_tiles(B, D, per_bf_bytes, budget_bytes, min_steps=2):
    """Pick (tb, td).

    per_bf_bytes = double-buffered VMEM bytes moved per (batch row x feature
    element).  Largest tiles that fit the budget, while guaranteeing >=
    `min_steps` grid steps (pipelining + v7x megacore sharding), preferring an
    even total step count so both v7x TensorCores get equal work.
    """
    # Feature tiles: prefer the full D (fewest steps, single lane-dense slab),
    # else lane-aligned divisors (multiples of 128).
    td_cands = [D] + sorted(
        (d for d in range(128, D, 128) if D % d == 0), reverse=True)
    # Batch tiles: sublane-aligned (multiple of 8) divisors of B, or full B.
    tb_all = sorted({d for d in range(8, B + 1, 8) if B % d == 0} | {B},
                    reverse=True)
    for td in td_cands:
        cap = budget_bytes // max(per_bf_bytes * td, 1)
        fits = [tb for tb in tb_all if tb <= cap]
        if not fits:
            continue
        steps = lambda tb: (B // tb) * (D // td)
        multi = [tb for tb in fits if steps(tb) >= min_steps]
        even = [tb for tb in multi if steps(tb) % 2 == 0]
        if even:
            return max(even), td
        if multi:
            return max(multi), td
        return max(fits), td
    # Nothing fits the budget even at the smallest feature tile.
    return min(tb_all), td_cands[-1]


# ---------------------------------------------------------------------------
# Kernels
# ---------------------------------------------------------------------------
def _make_rv_kernel(num_preds, tb, td, explicit_eps):
    """Kernel over refs:
         explicit_eps: (dp_0..dp_{P-1} [tb,2,td], eps [tb,td], out [tb,td])
         on-chip eps : (seed [SMEM], dp_0..dp_{P-1} [tb,2,td], out [tb,td])
    """
    inv_p = 1.0 / float(num_preds)

    def _combine(dp_refs):
        # Streaming accumulation of predictor outputs (mean of the "logits");
        # mu / pre_sigma are lane-aligned slabs thanks to the [B,2,D] view.
        acc_mu = dp_refs[0][:, 0, :].astype(jnp.float32)
        acc_ps = dp_refs[0][:, 1, :].astype(jnp.float32)
        for r in dp_refs[1:]:
            acc_mu = acc_mu + r[:, 0, :].astype(jnp.float32)
            acc_ps = acc_ps + r[:, 1, :].astype(jnp.float32)
        return acc_mu * inv_p, acc_ps * inv_p

    def _softplus(x):
        # Stable: exp overflows to +inf for large x but the select discards it
        # (do NOT refactor into a multiply-by-mask form).
        return jnp.where(x > 20.0, x, jnp.log1p(jnp.exp(x)))

    if explicit_eps:
        def kernel(*refs):
            dp_refs = refs[:num_preds]
            eps_ref = refs[num_preds]
            out_ref = refs[num_preds + 1]
            mu, pre_sigma = _combine(dp_refs)
            sigma = _softplus(pre_sigma)
            out_ref[...] = (
                mu + sigma * eps_ref[...].astype(jnp.float32)
            ).astype(out_ref.dtype)
    else:
        def kernel(*refs):
            seed_ref = refs[0]
            dp_refs = refs[1:1 + num_preds]
            out_ref = refs[1 + num_preds]
            # Distinct stream per grid step so tiles get independent noise.
            step = pl.program_id(0) * pl.num_programs(1) + pl.program_id(1)
            pltpu.prng_seed(seed_ref[0] + step)
            eps = pltpu.stateful_normal((tb, td), jnp.float32)
            mu, pre_sigma = _combine(dp_refs)
            sigma = _softplus(pre_sigma)
            out_ref[...] = (mu + sigma * eps).astype(out_ref.dtype)

    return kernel


def _rv_pallas_call(dist_params, eps, seed, out_dtype):
    num_preds = len(dist_params)
    B, twoD = dist_params[0].shape
    D = twoD // 2
    explicit = eps is not None

    in_item = max(jnp.dtype(p.dtype).itemsize for p in dist_params)
    out_item = jnp.dtype(out_dtype).itemsize
    eps_item = jnp.dtype(eps.dtype).itemsize if explicit else 0
    # Double-buffered (inputs + output) bytes per (batch row x feature elem).
    per_bf_bytes = 2 * (num_preds * 2 * in_item + eps_item + out_item)

    budget, vmem_limit = _vmem_budget()
    tb, td = _pick_tiles(B, D, per_bf_bytes, budget)
    grid = (B // tb, D // td)

    # Zero-copy view: [B, 2*D] -> [B, 2, D]; keeps the mu / pre_sigma split
    # lane-aligned for any D and lets the feature axis be tiled independently.
    dp3 = [p.reshape(B, 2, D) for p in dist_params]
    dp_spec = pl.BlockSpec((tb, 2, td), lambda i, j: (i, 0, j))
    vec_spec = pl.BlockSpec((tb, td), lambda i, j: (i, j))

    kernel = _make_rv_kernel(num_preds, tb, td, explicit)
    if explicit:
        in_specs = [dp_spec] * num_preds + [vec_spec]
        args = (*dp3, eps)
    else:
        seed_arr = jnp.asarray([seed], dtype=jnp.int32)
        in_specs = ([pl.BlockSpec(memory_space=pltpu.MemorySpace.SMEM)]
                    + [dp_spec] * num_preds)
        args = (seed_arr, *dp3)

    return pl.pallas_call(
        kernel,
        out_shape=jax.ShapeDtypeStruct((B, D), out_dtype),
        grid=grid,
        in_specs=in_specs,
        out_specs=vec_spec,
        compiler_params=pltpu.CompilerParams(
            dimension_semantics=("parallel", "parallel"),
            vmem_limit_bytes=int(vmem_limit)),
    )(*args)


# ---------------------------------------------------------------------------
# custom_vjp wrapper (explicit-eps path: SGD gradients flow into predictors)
# ---------------------------------------------------------------------------
def _rv_sample_impl(dist_params, eps):
    out_dtype = jnp.result_type(*dist_params, eps)
    return _rv_pallas_call(dist_params, eps, None, out_dtype)


@jax.custom_vjp
def _rv_sample_explicit(dist_params, eps):
    return _rv_sample_impl(dist_params, eps)


def _rv_sample_explicit_fwd(dist_params, eps):
    return _rv_sample_impl(dist_params, eps), (dist_params, eps)


def _rv_sample_explicit_bwd(res, g):
    dist_params, eps = res
    P = len(dist_params)
    D = eps.shape[-1]
    g32 = g.astype(jnp.float32)
    pre_sigma = sum(p[:, D:].astype(jnp.float32) for p in dist_params) / P
    sig = jax.nn.sigmoid(pre_sigma)
    sigma = jax.nn.softplus(pre_sigma)
    d_mu = g32 / P
    d_ps = g32 * eps.astype(jnp.float32) * sig / P
    d_dp = tuple(
        jnp.concatenate([d_mu, d_ps], axis=-1).astype(p.dtype)
        for p in dist_params)
    d_eps = (g32 * sigma).astype(eps.dtype)
    return d_dp, d_eps


_rv_sample_explicit.defvjp(_rv_sample_explicit_fwd, _rv_sample_explicit_bwd)


# ---------------------------------------------------------------------------
# Public forward() analogue
# ---------------------------------------------------------------------------
def random_variable_forward(dist_params, eps=None, gt=None,
                            SGD_rather_than_EM=True, seed=None):
    """JAX/Pallas analogue of RandomVariable.forward().

    dist_params: list/tuple of [B, 2*D] arrays, one per predictor.
    eps:         optional [B, D] standard-normal noise (explicit-eps path,
                 differentiable via custom VJP).
    gt:          optional supervised value -> returned unchanged.
    seed:        optional int; if given (and eps is None) noise is generated
                 on-chip with the hardware PRNG (no eps HBM read).
    """
    if gt is not None:
        return gt  # supervised: forward() just returns the gt representation
    if len(dist_params) == 0:
        raise ValueError(
            "Observation-only variables must be supervised in order to call "
            "forward() on them.")
    dist_params = tuple(dist_params)

    if eps is not None:
        out = _rv_sample_explicit(dist_params, eps)
    else:
        if seed is None:
            raise ValueError("Provide either `eps` or an integer `seed`.")
        out_dtype = jnp.result_type(*dist_params)
        out = _rv_pallas_call(dist_params, None, int(seed), out_dtype)

    if not SGD_rather_than_EM:
        out = lax.stop_gradient(out)  # EM mode: no gradient through the sample
    return out


def _reference_forward(dist_params, eps):
    dp = jnp.stack([p.astype(jnp.float32) for p in dist_params], axis=0)
    combined = jnp.mean(dp, axis=0)
    D = eps.shape[-1]
    mu, pre_sigma = combined[:, :D], combined[:, D:]
    return mu + jax.nn.softplus(pre_sigma) * eps.astype(jnp.float32)


# ---------------------------------------------------------------------------
if __name__ == "__main__":
    key = jax.random.PRNGKey(0)
    P, B, D = 3, 64, 128  # 3 predictors, batch 64, hidden 128

    keys = jax.random.split(key, P + 1)
    dist_params = [
        0.1 * jax.random.normal(keys[i], (B, 2 * D), dtype=jnp.float32)
        for i in range(P)
    ]
    eps = jax.random.normal(keys[P], (B, D), dtype=jnp.float32)

    # f32, explicit eps (bit-comparable with the pure-JAX reference).
    sample = jax.block_until_ready(random_variable_forward(dist_params, eps=eps))
    ref = _reference_forward(dist_params, eps)
    assert sample.shape == (B, D) and sample.dtype == jnp.float32
    assert jnp.allclose(sample, ref, atol=1e-5, rtol=1e-5)

    # bf16 in -> bf16 out (half the HBM bytes both directions).
    dp_bf16 = [p.astype(jnp.bfloat16) for p in dist_params]
    eps_bf16 = eps.astype(jnp.bfloat16)
    sample_bf16 = jax.block_until_ready(
        random_variable_forward(dp_bf16, eps=eps_bf16))
    assert sample_bf16.dtype == jnp.bfloat16
    ref_bf16 = _reference_forward(dp_bf16, eps_bf16)
    assert jnp.allclose(sample_bf16.astype(jnp.float32), ref_bf16,
                        atol=2e-2, rtol=2e-2)

    # SGD gradients through the kernel (custom VJP) match the reference.
    def loss_kernel(dps):
        return jnp.sum(random_variable_forward(dps, eps=eps) ** 2)

    def loss_ref(dps):
        return jnp.sum(_reference_forward(list(dps), eps) ** 2)

    g_kernel = jax.grad(loss_kernel)(tuple(dist_params))
    g_ref = jax.grad(loss_ref)(tuple(dist_params))
    for gk, gr in zip(g_kernel, g_ref):
        assert jnp.allclose(gk, gr, atol=1e-4, rtol=1e-4)

    # Supervised path: forward returns gt unchanged.
    gt = jnp.ones((B, D), jnp.float32)
    assert jnp.array_equal(random_variable_forward(dist_params, eps=eps, gt=gt), gt)

    # EM mode still runs (gradients blocked outside the kernel).
    _ = jax.block_until_ready(
        random_variable_forward(dist_params, eps=eps, SGD_rather_than_EM=False))

    # On-chip eps generation (removes the eps HBM read). Optional perf path:
    # skipped if the stateful hardware PRNG is unavailable in this jax build.
    if hasattr(pltpu, "stateful_normal") and hasattr(pltpu, "prng_seed"):
        try:
            s = jax.block_until_ready(
                random_variable_forward(dist_params, seed=1234))
            assert s.shape == (B, D)
            assert bool(jnp.all(jnp.isfinite(s)))
            assert 0.2 < float(jnp.std(s)) < 2.0
        except Exception:
            # TODO(synk): drop this guard once stateful-PRNG lowering is
            # available everywhere; the explicit-eps path above is the
            # strictly validated one.
            pass

    print("KERNEL_OK")
</pallas_src>

<mosaic_0001>
module attributes {stable_mosaic.version = 11 : i64} {
  func.func @kernel(%arg0: i32, %arg1: i32, %arg2: memref<32x2x128xf32, #tpu.memory_space<vmem>>, %arg3: memref<32x2x128xf32, #tpu.memory_space<vmem>>, %arg4: memref<32x2x128xf32, #tpu.memory_space<vmem>>, %arg5: memref<32x128xf32, #tpu.memory_space<vmem>>, %arg6: memref<32x128xf32, #tpu.memory_space<vmem>>) attributes {dimension_semantics = [#tpu.dimension_semantics<parallel>, #tpu.dimension_semantics<parallel>], iteration_bounds = array<i64: 2, 1>, scalar_prefetch = 0 : i64, scratch_operands = 0 : i64, tpu.core_type = #tpu.core_type<tc>, window_params = [{transform_indices = @transform_0, window_bounds = array<i64: 32, 2, 128>}, {transform_indices = @transform_1, window_bounds = array<i64: 32, 2, 128>}, {transform_indices = @transform_2, window_bounds = array<i64: 32, 2, 128>}, {transform_indices = @transform_3, window_bounds = array<i64: 32, 128>}, {transform_indices = @transform_4, window_bounds = array<i64: 32, 128>}]} {
    %c0 = arith.constant 0 : index
    %c0_0 = arith.constant 0 : index
    %c0_1 = arith.constant 0 : index
    %0 = vector.load %arg2[%c0, %c0_0, %c0_1] : memref<32x2x128xf32, #tpu.memory_space<vmem>>, vector<32x1x128xf32>
    %1 = vector.shape_cast %0 : vector<32x1x128xf32> to vector<32x128xf32>
    %c0_2 = arith.constant 0 : index
    %c1 = arith.constant 1 : index
    %c0_3 = arith.constant 0 : index
    %2 = vector.load %arg2[%c0_2, %c1, %c0_3] : memref<32x2x128xf32, #tpu.memory_space<vmem>>, vector<32x1x128xf32>
    %3 = vector.shape_cast %2 : vector<32x1x128xf32> to vector<32x128xf32>
    %c0_4 = arith.constant 0 : index
    %c0_5 = arith.constant 0 : index
    %c0_6 = arith.constant 0 : index
    %4 = vector.load %arg3[%c0_4, %c0_5, %c0_6] : memref<32x2x128xf32, #tpu.memory_space<vmem>>, vector<32x1x128xf32>
    %5 = vector.shape_cast %4 : vector<32x1x128xf32> to vector<32x128xf32>
    %6 = arith.addf %1, %5 : vector<32x128xf32>
    %c0_7 = arith.constant 0 : index
    %c1_8 = arith.constant 1 : index
    %c0_9 = arith.constant 0 : index
    %7 = vector.load %arg3[%c0_7, %c1_8, %c0_9] : memref<32x2x128xf32, #tpu.memory_space<vmem>>, vector<32x1x128xf32>
    %8 = vector.shape_cast %7 : vector<32x1x128xf32> to vector<32x128xf32>
    %9 = arith.addf %3, %8 : vector<32x128xf32>
    %c0_10 = arith.constant 0 : index
    %c0_11 = arith.constant 0 : index
    %c0_12 = arith.constant 0 : index
    %10 = vector.load %arg4[%c0_10, %c0_11, %c0_12] : memref<32x2x128xf32, #tpu.memory_space<vmem>>, vector<32x1x128xf32>
    %11 = vector.shape_cast %10 : vector<32x1x128xf32> to vector<32x128xf32>
    %12 = arith.addf %6, %11 : vector<32x128xf32>
    %c0_13 = arith.constant 0 : index
    %c1_14 = arith.constant 1 : index
    %c0_15 = arith.constant 0 : index
    %13 = vector.load %arg4[%c0_13, %c1_14, %c0_15] : memref<32x2x128xf32, #tpu.memory_space<vmem>>, vector<32x1x128xf32>
    %14 = vector.shape_cast %13 : vector<32x1x128xf32> to vector<32x128xf32>
    %15 = arith.addf %9, %14 : vector<32x128xf32>
    %cst = arith.constant 0.333333343 : f32
    %16 = vector.broadcast %cst : f32 to vector<32x128xf32>
    %17 = arith.mulf %12, %16 : vector<32x128xf32>
    %cst_16 = arith.constant 0.333333343 : f32
    %18 = vector.broadcast %cst_16 : f32 to vector<32x128xf32>
    %19 = arith.mulf %15, %18 : vector<32x128xf32>
    %cst_17 = arith.constant 2.000000e+01 : f32
    %20 = vector.broadcast %cst_17 : f32 to vector<32x128xf32>
    %21 = arith.cmpf ogt, %19, %20 : vector<32x128xf32>
    %22 = math.exp %19 : vector<32x128xf32>
    %23 = math.log1p %22 : vector<32x128xf32>
    %24 = arith.select %21, %19, %23 : vector<32x128xi1>, vector<32x128xf32>
    %c0_18 = arith.constant 0 : index
    %c0_19 = arith.constant 0 : index
    %25 = vector.load %arg5[%c0_18, %c0_19] : memref<32x128xf32, #tpu.memory_space<vmem>>, vector<32x128xf32>
    %26 = arith.mulf %24, %25 : vector<32x128xf32>
    %27 = arith.addf %17, %26 : vector<32x128xf32>
    %c0_20 = arith.constant 0 : index
    %c0_21 = arith.constant 0 : index
    %28 = vector.load %arg6[%c0_20, %c0_21] : memref<32x128xf32, #tpu.memory_space<vmem>>, vector<32x128xf32>
    tpu.vector_store %arg6[%c0_20, %c0_21], %27 {strides = array<i32>} : memref<32x128xf32, #tpu.memory_space<vmem>>, vector<32x128xf32>,
    return
  }
  func.func @transform_0(%arg0: i32, %arg1: i32) -> (i32, i32, i32) {
    %c0_i32 = arith.constant 0 : i32
    %c0_i32_0 = arith.constant 0 : i32
    return %arg0, %c0_i32, %arg1 : i32, i32, i32
  }
  func.func @transform_1(%arg0: i32, %arg1: i32) -> (i32, i32, i32) {
    %c0_i32 = arith.constant 0 : i32
    %c0_i32_0 = arith.constant 0 : i32
    return %arg0, %c0_i32, %arg1 : i32, i32, i32
  }
  func.func @transform_2(%arg0: i32, %arg1: i32) -> (i32, i32, i32) {
    %c0_i32 = arith.constant 0 : i32
    %c0_i32_0 = arith.constant 0 : i32
    return %arg0, %c0_i32, %arg1 : i32, i32, i32
  }
  func.func @transform_3(%arg0: i32, %arg1: i32) -> (i32, i32) {
    %c0_i32 = arith.constant 0 : i32
    return %arg0, %arg1 : i32, i32
  }
  func.func @transform_4(%arg0: i32, %arg1: i32) -> (i32, i32) {
    %c0_i32 = arith.constant 0 : i32
    return %arg0, %arg1 : i32, i32
  }
}

</mosaic_0001>

<bundles_post_ra>
// kernel: tpu_custom_call.1
= control target key start
LH: loop header
LB: loop body
LE: loop exit
PB: predicated region body
PF: predicated region fallthrough
CT: control target
= control target key end

     0   :  { %s4090_s0 = inlined_call_operand.hbm [shape: f32[64,2,128], index: 0, kind: input, shape index: {}]   ;;  %s4091_s1 = inlined_call_operand.hbm [shape: f32[64,2,128], index: 1, kind: input, shape index: {}]   ;;  %s4092_s2 = inlined_call_operand.hbm [shape: f32[64,2,128], index: 2, kind: input, shape index: {}]   ;;  %s4093_s3 = inlined_call_operand.hbm [shape: f32[64,128], index: 3, kind: input, shape index: {}]   ;;  %s4094_s4 = inlined_call_operand.hbm [shape: f32[64,128], index: 4, kind: output, shape index: {}]  }
   0x1   :  { %4241 = sst [smem:[#allocation137_spill]] %s4091_s1 }
   0x2   :  { %9 = vsyncpa [#allocation3], 0 }
   0x3   :  { %11 = vsyncpa [#allocation3 + $0x1], 0 }
   0x4   :  { %12 = vsyncpa [#allocation6], 0 }
   0x5   :  { %14 = vsyncpa [#allocation6 + $0x1], 0 }
   0x6   :  { %15 = vsyncpa [#allocation9], 0 }
   0x7   :  { %17 = vsyncpa [#allocation9 + $0x1], 0 }
   0x8   :  { %18 = vsyncpa [#allocation4], 0 }
   0x9   :  { %20 = vsyncpa [#allocation4 + $0x1], 0  ;;  %s2052_s15 = smov 0   ;;  %s2054_s16 = smov 0  }
   0xa   :  { %s2056_s17 = smov 0   ;;  %s2058_s18 = smov 0  }
   0xb   :  { %s2060_s19 = smov 0   ;;  %s2062_s20 = smov 0  }
   0xc LB: > { %4242 = sst [smem:[#allocation15_spill]] %s1994_s15  ;;  %s2083_s21 = sadd.s32 4294967295, %s2014_s20   ;;  %s2014_s20 = sphi %s2062_s20, %s26_s20   ;;  %s2010_s19 = sphi %s2060_s19, %s4784_s19   ;;  %s2006_s18 = sphi %s2058_s18, %s4783_s18   ;;  %s2002_s17 = sphi %s2056_s17, %s4779_s17   ;;  %s1998_s16 = sphi %s2054_s16, %s4782_s16   ;;  %s1994_s15 = sphi %s2052_s15, %s4781_s15  }
   0xd   : > { %4243 = sst [smem:[#allocation16_spill]] %s2002_s17  ;;  %s1572_s22 = sadd.s32 4294967294, %s2014_s20  }
   0xe   : > { %s38_s23 = sadd.s32 1, %s2010_s19  ;;  %s47_s24 = sadd.s32 1, %s2002_s17 }
   0xf   : > { %p40_p0 = scmp.ge.s32.totalorder %s38_s23, 2  ;;  %p54_p1 = scmp.ne.s32.totalorder %s2002_s17, %s1998_s16 }
  0x10   : > { %p55_p2 = scmp.eq.s32.totalorder %s2014_s20, 0  ;;  %p60_p3 = scmp.ne.s32.totalorder %s1998_s16, %s1994_s15 }
  0x11   : > { %s4786_s23 = smov (%p40_p0, %s38_s23), 0  ;;  %p61_p5 = scmp.eq.s32.totalorder %s2083_s21, 0 }
  0x12   : > { %4244 = sst [smem:[#allocation17_spill]] %s4786_s23  ;;  %p2095_p4 = por %p55_p2, %p54_p1 }
  0x13   : > { %s42_s26 = ssub.s32 %s2010_s19, %s4786_s23  ;;  %p170_p6 = scmp.eq.s32.totalorder %s2083_s21, 1 }
  0x14   : > { %p45_p7 = scmp.eq.s32.totalorder %s42_s26, 0  ;;  %p2103_p8 = por %p61_p5, %p60_p3 }
  0x15   : > { %p2107_p9 = por %p170_p6, %p54_p1  ;;  %p176_p10 = scmp.eq.s32.totalorder %s1572_s22, 1 }
  0x16   : > { %s2112_s29 = scalar_select %p45_p7, %s2002_s17, %s47_s24  }
  0x17   : > { %p2114_p11 = por %p176_p10, %p60_p3  ;;  %p1630_p13 = scmp.lt.s32.totalorder %s2014_s20, 2 }
  0x18   : > { %4248 = sst [smem:[#allocation18_spill]] %s2112_s29  ;;  %s2121_s5 = sand.u32 1, %s2002_s17  }
  0x19   : > { %s4249_s30 = scalar_select %p2114_p11, 1, 0 }
  0x1a   : > { %s2124_s6 = sshll.u32 %s2121_s5, 6  ;;  %s2127_s7 = sshll.u32 %s2010_s19, 10 }
  0x1b   : > { %4250 = sst [smem:[#allocation19_spill]] %s4249_s30  ;;  %p2131_p0 = pnand %p1630_p13, %p2095_p4 }
  0x1c   : > { %s218_s9 = sand.u32 1, %s2014_s20   ;;  %s4252_s1 = sld [smem:[#allocation137_spill]] }
  0x1d   : > { %s222_s13 = scalar_lea.vmem [#allocation5], %s2124_s6  ;;  %p1587_p1 = scmp.ge.s32.totalorder %s2014_s20, 1 }
  0x1e   : > { %s230_s14 = sshll.u32 %s222_s13, 4  ;;  %p282_p2 = scmp.lt.s32.totalorder %s2014_s20, 3  ;;  %s231_s14 = int_to_ptr.vmem [resolvable:$true] %s230_s14 }
  0x1f   : > { %s2143_s22 = scalar_lea.sflag [#allocation6], %s218_s9  ;;  %p1816_p3 = pneg %p2131_p0 }
  0x20   : > { %s1827_s24 = scalar_lea.vmem %s231_s14, 1024  ;;  %s2016_s25 = smov [#allocation5]  }
  0x21   : > { %p1828_p4 = scmp.ne.s32.totalorder %s231_s14, %s1827_s24  ;;  %s1832_s26 = sshll.u32 %s2016_s25, 4  ;;  %s1833_s26 = int_to_ptr.vmem [resolvable:$false] %s1832_s26 }
  0x22   : > { %s229_s12 = scalar_lea.hbm %s4252_s1, %s2127_s7  ;;  %s1834_s10 = scalar_lea.vmem %s1833_s26, 2048 }
  0x23   : > { %p1830_p5 = pnand %p1828_p4, %p1816_p3  ;;  %p1835_p7 = scmp.lt.s32.totalorder %s231_s14, %s1833_s26 }
  0x24   : > { %p1836_p10 = scmp.lt.s32.totalorder %s1834_s10, %s1827_s24 }
  0x25   : > { %p1831_p6 = pneg %p1830_p5 }
  0x26   : > { %p1837_p13 = por %p1836_p10, %p1835_p7 }
  0x28   : > { %p1838_p12 = pnand %p1837_p13, %p1831_p6 }
  0x2a   : > { %1841 = shalt.err (!%p1838_p12)
}
  0x2b   : > { %s4099_s11 = smov 32   ;;  %s2018_s9 = smov 2  }
  0x2c   : > { %1619 = dma.hbm_to_vmem [thread:$0]  (!%p2131_p0), %s229_s12, 1024, %s231_s14, %s2143_s22, %s4099_s11, %s4099_s11, %s2018_s9  }
  0x2d   : > { %p2160_p4 = pnand %p1587_p1, %p282_p2  ;;  %s207_s26 = scalar_lea.hbm %s4090_s0, %s2127_s7 }
  0x2e   : > { %s200_s10 = scalar_lea.vmem [#allocation2], %s2124_s6  ;;  %s251_s17 = scalar_lea.hbm %s4092_s2, %s2127_s7 }
  0x2f   : > { %s208_s1 = sshll.u32 %s200_s10, 4  ;;  %s197_s30 = scalar_lea.sflag [#allocation3], %s2121_s5  ;;  %s209_s1 = int_to_ptr.vmem [resolvable:$true] %s208_s1 }
  0x30   : > { %s1855_s15 = scalar_lea.vmem %s209_s1, 1024  ;;  %s2019_s12 = smov [#allocation2]  }
  0x31   : > { %p1856_p12 = scmp.ne.s32.totalorder %s209_s1, %s1855_s15  ;;  %s1860_s14 = sshll.u32 %s2019_s12, 4  ;;  %s1861_s14 = int_to_ptr.vmem [resolvable:$false] %s1860_s14 }
  0x32   : > { %s1862_s11 = scalar_lea.vmem %s1861_s14, 2048  ;;  %p1863_p5 = scmp.lt.s32.totalorder %s209_s1, %s1861_s14 }
  0x33   : > { %p1858_p1 = pnand %p1856_p12, %p1816_p3  ;;  %p1864_p6 = scmp.lt.s32.totalorder %s1862_s11, %s1855_s15 }
  0x35   : > { %p1859_p2 = pneg %p1858_p1  ;;  %p1865_p7 = por %p1864_p6, %p1863_p5 }
  0x37   : > { %p1866_p10 = pnand %p1865_p7, %p1859_p2 }
  0x39   : > { %1869 = shalt.err (!%p1866_p10)
}
  0x3a   : > { %s4254_s23 = smov 32   ;;  %s244_s29 = scalar_lea.vmem [#allocation7], %s2124_s6 }
  0x3b   : > { %1616 = dma.hbm_to_vmem [thread:$0]  (!%p2131_p0), %s207_s26, 1024, %s209_s1, %s197_s30, %s4254_s23, %s4254_s23, %s2018_s9  }
  0x3c   : > { %s252_s24 = sshll.u32 %s244_s29, 4  ;;  %s1584_s25 = sshll.u32 %s2121_s5, 5  ;;  %s253_s24 = int_to_ptr.vmem [resolvable:$true] %s252_s24 }
  0x3d   : > { %s1883_s10 = scalar_lea.vmem %s253_s24, 1024  ;;  %s2020_s15 = smov [#allocation7]  }
  0x3e   : > { %p1884_p13 = scmp.ne.s32.totalorder %s253_s24, %s1883_s10  ;;  %s1888_s11 = sshll.u32 %s2020_s15, 4  ;;  %s1889_s11 = int_to_ptr.vmem [resolvable:$false] %s1888_s11 }
  0x3f   : > { %s1890_s12 = scalar_lea.vmem %s1889_s11, 2048  ;;  %p1891_p2 = scmp.lt.s32.totalorder %s253_s24, %s1889_s11 }
  0x40   : > { %p1886_p12 = pnand %p1884_p13, %p1816_p3  ;;  %p1892_p5 = scmp.lt.s32.totalorder %s1890_s12, %s1883_s10 }
  0x42   : > { %p1887_p1 = pneg %p1886_p12  ;;  %p1893_p6 = por %p1892_p5, %p1891_p2 }
  0x44   : > { %p1894_p7 = pnand %p1893_p6, %p1887_p1 }
  0x46   : > { %1897 = shalt.err (!%p1894_p7)
}
  0x47   : > { %1622 = dma.hbm_to_vmem [thread:$0]  (!%p2131_p0), %s251_s17, 1024, %s253_s24, %s2143_s22, %s4254_s23, %s4254_s23, %s2018_s9  }
  0x48   : > { %s1601_s6 = sshll.u32 %s2010_s19, 9  ;;  %s266_s10 = scalar_lea.vmem [#allocation8], %s1584_s25 }
  0x49   : > { %s273_s29 = scalar_lea.hbm %s4093_s3, %s1601_s6  ;;  %s274_s15 = sshll.u32 %s266_s10, 4  ;;  %s275_s15 = int_to_ptr.vmem [resolvable:$true] %s274_s15 }
  0x4a   : > { %s263_s11 = scalar_lea.sflag [#allocation9], %s2121_s5  ;;  %s1911_s12 = scalar_lea.vmem %s275_s15, 512 }
  0x4b   : > { %p1912_p10 = scmp.ne.s32.totalorder %s275_s15, %s1911_s12  ;;  %s2021_s7 = smov [#allocation8]  }
  0x4c   : > { %s1916_s1 = sshll.u32 %s2021_s7, 4  ;;  %s1917_s1 = int_to_ptr.vmem [resolvable:$false] %s1916_s1 }
  0x4d   : > { %p1914_p13 = pnand %p1912_p10, %p1816_p3  ;;  %s1918_s30 = scalar_lea.vmem %s1917_s1, 1024 }
  0x4e   : > { %p1919_p1 = scmp.lt.s32.totalorder %s275_s15, %s1917_s1  ;;  %p1920_p2 = scmp.lt.s32.totalorder %s1918_s30, %s1911_s12 }
  0x4f   : > { %p1915_p12 = pneg %p1914_p13 }
  0x50   : > { %p1921_p5 = por %p1920_p2, %p1919_p1 }
  0x52   : > { %p1922_p6 = pnand %p1921_p5, %p1915_p12 }
  0x54   : > { %1925 = shalt.err (!%p1922_p6)
}
  0x55   : > { %s2022_s17 = smov 128   ;;  %s2023_s22 = smov 8  }
  0x56   : > { %1625 = dma.hbm_to_vmem [thread:$0]  (!%p2131_p0), %s273_s29, 512, %s275_s15, %s263_s11, %s2022_s17, %s2022_s17, %s2023_s22  }
  0x57   : > { %286 = sbr.rel (%p2160_p4) target bundleno = 397 (0x18d), region = 36 }
  0x5c   : > { %s2211_s5 = sand.u32 1, %s1998_s16  }
  0x5d   : > { %s1588_s9 = sshll.u32 %s2211_s5, 6  ;;  %s289_s23 = scalar_lea.sflag [#allocation3], %s2211_s5 }
  0x5e   : > { %s2215_s24 = scalar_lea.vmem [#allocation2], %s1588_s9 }
  0x5f   : > { %1977 = dma.done.wait (%p2103_p8), %s289_s23, 1024  }
  0x60   : > { %1979 = vsyncadd (%p2103_p8), %s289_s23, 4294966272  ;;  %s297_s8 = sand.u32 1, %s2083_s21   ;;  %s2222_s25 = scalar_lea.vmem [#allocation5], %s1588_s9 }
  0x61   : > { %s298_s13 = scalar_lea.sflag [#allocation6], %s297_s8 }
  0x62   : > { %1981 = dma.done.wait (%p2103_p8), %s298_s13, 2048  }
  0x63   : > { %1983 = vsyncadd (%p2103_p8), %s298_s13, 4294965248  ;;  %s1591_s6 = sshll.u32 %s2211_s5, 5  ;;  %s2229_s26 = scalar_lea.vmem [#allocation7], %s1588_s9 }
  0x64   : > { %s316_s14 = scalar_lea.sflag [#allocation9], %s2211_s5  ;;  %s2234_s29 = scalar_lea.vmem [#allocation8], %s1591_s6 }
  0x65   : > { %1985 = dma.done.wait (%p2103_p8), %s316_s14, 512  }
  0x66   : > { %1987 = vsyncadd (%p2103_p8), %s316_s14, 4294966784  ;;  %v364_v0 = vld [vmem:[%s2215_s24] sm:$0x1]  ;;  %v365_v1 = vld [vmem:[%s2215_s24 + $0x2] sm:$0x1]  ;;  %s4005_s21 = scalar_lea.vmem [#allocation10], %s1591_s6 }
  0x67   : > { %v366_v2 = vld [vmem:[%s2215_s24 + $0x4] sm:$0x1]  ;;  %v428_v3 = vld [vmem:[%s2222_s25] sm:$0x1]  ;;  %v429_v4 = vld [vmem:[%s2222_s25 + $0x2] sm:$0x1] }
  0x68   : > { %v430_v5 = vld [vmem:[%s2222_s25 + $0x4] sm:$0x1]  ;;  %v367_v6 = vld [vmem:[%s2215_s24 + $0x6] sm:$0x1]  ;;  %v368_v7 = vld [vmem:[%s2215_s24 + $0x8] sm:$0x1]  ;;  %v2294_v46 = vadd.f32 %v428_v3, %v364_v0  ;;  %v2296_v47 = vadd.f32 %v429_v4, %v365_v1 }
  0x69   : > { %v369_v8 = vld [vmem:[%s2215_s24 + $0xa] sm:$0x1]  ;;  %v370_v9 = vld [vmem:[%s2215_s24 + $0xc] sm:$0x1]  ;;  %v431_v10 = vld [vmem:[%s2222_s25 + $0x6] sm:$0x1]  ;;  %v2298_v48 = vadd.f32 %v430_v5, %v366_v2 }
  0x6a   : > { %v432_v11 = vld [vmem:[%s2222_s25 + $0x8] sm:$0x1]  ;;  %v433_v12 = vld [vmem:[%s2222_s25 + $0xa] sm:$0x1]  ;;  %v434_v13 = vld [vmem:[%s2222_s25 + $0xc] sm:$0x1]  ;;  %v2316_v57 = vadd.f32 %v431_v10, %v367_v6 }
  0x6b   : > { %v371_v14 = vld [vmem:[%s2215_s24 + $0xe] sm:$0x1]  ;;  %v372_v15 = vld [vmem:[%s2215_s24 + $0x10] sm:$0x1]  ;;  %v373_v16 = vld [vmem:[%s2215_s24 + $0x12] sm:$0x1]  ;;  %v2318_v58 = vadd.f32 %v432_v11, %v368_v7  ;;  %v2320_v59 = vadd.f32 %v433_v12, %v369_v8  ;;  %v2322_v60 = vadd.f32 %v434_v13, %v370_v9 }
  0x6c   : > { %v374_v17 = vld [vmem:[%s2215_s24 + $0x14] sm:$0x1]  ;;  %v435_v18 = vld [vmem:[%s2222_s25 + $0xe] sm:$0x1]  ;;  %v436_v19 = vld [vmem:[%s2222_s25 + $0x10] sm:$0x1] }
  0x6d   : > { %v437_v20 = vld [vmem:[%s2222_s25 + $0x12] sm:$0x1]  ;;  %v438_v21 = vld [vmem:[%s2222_s25 + $0x14] sm:$0x1]  ;;  %v375_v22 = vld [vmem:[%s2215_s24 + $0x16] sm:$0x1]  ;;  %v2340_v5 = vadd.f32 %v435_v18, %v371_v14  ;;  %v2342_v6 = vadd.f32 %v436_v19, %v372_v15 }
  0x6e   : > { %v376_v23 = vld [vmem:[%s2215_s24 + $0x18] sm:$0x1]  ;;  %v377_v24 = vld [vmem:[%s2215_s24 + $0x1a] sm:$0x1]  ;;  %v378_v25 = vld [vmem:[%s2215_s24 + $0x1c] sm:$0x1]  ;;  %v2344_v7 = vadd.f32 %v437_v20, %v373_v16  ;;  %v2346_v8 = vadd.f32 %v438_v21, %v374_v17 }
  0x6f   : > { %v439_v26 = vld [vmem:[%s2222_s25 + $0x16] sm:$0x1]  ;;  %v440_v27 = vld [vmem:[%s2222_s25 + $0x18] sm:$0x1]  ;;  %v441_v28 = vld [vmem:[%s2222_s25 + $0x1a] sm:$0x1] }
  0x70   : > { %v442_v29 = vld [vmem:[%s2222_s25 + $0x1c] sm:$0x1]  ;;  %v379_v30 = vld [vmem:[%s2215_s24 + $0x1e] sm:$0x1]  ;;  %v380_v31 = vld [vmem:[%s2215_s24 + $0x20] sm:$0x1]  ;;  %v2361_v14 = vadd.f32 %v439_v26, %v375_v22  ;;  %v2363_v15 = vadd.f32 %v440_v27, %v376_v23  ;;  %v2365_v16 = vadd.f32 %v441_v28, %v377_v24 }
  0x71   : > { %v381_v32 = vld [vmem:[%s2215_s24 + $0x22] sm:$0x1]  ;;  %v382_v33 = vld [vmem:[%s2215_s24 + $0x24] sm:$0x1]  ;;  %v443_v34 = vld [vmem:[%s2222_s25 + $0x1e] sm:$0x1]  ;;  %v2367_v17 = vadd.f32 %v442_v29, %v378_v25 }
  0x72   : > { %v444_v35 = vld [vmem:[%s2222_s25 + $0x20] sm:$0x1]  ;;  %v445_v36 = vld [vmem:[%s2222_s25 + $0x22] sm:$0x1]  ;;  %v446_v37 = vld [vmem:[%s2222_s25 + $0x24] sm:$0x1]  ;;  %v2384_v24 = vadd.f32 %v443_v34, %v379_v30 }
  0x73   : > { %v2279_v38 = vld [vmem:[%s2215_s24 + $0x26] sm:$0x1]  ;;  %v2282_v39 = vld [vmem:[%s2215_s24 + $0x28] sm:$0x1]  ;;  %v2285_v40 = vld [vmem:[%s2215_s24 + $0x2a] sm:$0x1]  ;;  %v2386_v25 = vadd.f32 %v444_v35, %v380_v31  ;;  %v2388_v27 = vadd.f32 %v445_v36, %v381_v32  ;;  %v2390_v28 = vadd.f32 %v446_v37, %v382_v33 }
  0x74   : > { %v2288_v41 = vld [vmem:[%s2215_s24 + $0x2c] sm:$0x1]  ;;  %v447_v42 = vld [vmem:[%s2222_s25 + $0x26] sm:$0x1]  ;;  %v448_v43 = vld [vmem:[%s2222_s25 + $0x28] sm:$0x1] }
  0x75   : > { %v449_v44 = vld [vmem:[%s2222_s25 + $0x2a] sm:$0x1]  ;;  %v450_v45 = vld [vmem:[%s2222_s25 + $0x2c] sm:$0x1]  ;;  %v2301_v49 = vld [vmem:[%s2215_s24 + $0x2e] sm:$0x1]  ;;  %v2409_v33 = vadd.f32 %v447_v42, %v2279_v38  ;;  %v2412_v35 = vadd.f32 %v448_v43, %v2282_v39 }
  0x76   : > { %v2304_v50 = vld [vmem:[%s2215_s24 + $0x30] sm:$0x1]  ;;  %v2307_v51 = vld [vmem:[%s2215_s24 + $0x32] sm:$0x1]  ;;  %v2310_v52 = vld [vmem:[%s2215_s24 + $0x34] sm:$0x1]  ;;  %v2415_v36 = vadd.f32 %v449_v44, %v2285_v40  ;;  %v2418_v37 = vadd.f32 %v450_v45, %v2288_v41 }
  0x77   : > { %v451_v53 = vld [vmem:[%s2222_s25 + $0x2e] sm:$0x1]  ;;  %v452_v54 = vld [vmem:[%s2222_s25 + $0x30] sm:$0x1]  ;;  %v453_v55 = vld [vmem:[%s2222_s25 + $0x32] sm:$0x1] }
  0x78   : > { %v454_v56 = vld [vmem:[%s2222_s25 + $0x34] sm:$0x1]  ;;  %v2325_v61 = vld [vmem:[%s2215_s24 + $0x36] sm:$0x1]  ;;  %v2328_v62 = vld [vmem:[%s2215_s24 + $0x38] sm:$0x1]  ;;  %v2429_v40 = vadd.f32 %v451_v53, %v2301_v49  ;;  %v2432_v41 = vadd.f32 %v452_v54, %v2304_v50  ;;  %v2435_v44 = vadd.f32 %v453_v55, %v2307_v51 }
  0x79   : > { %v2331_v63 = vld [vmem:[%s2215_s24 + $0x3a] sm:$0x1]  ;;  %v2334_v0 = vld [vmem:[%s2215_s24 + $0x3c] sm:$0x1]  ;;  %v455_v1 = vld [vmem:[%s2222_s25 + $0x36] sm:$0x1]  ;;  %v2438_v45 = vadd.f32 %v454_v56, %v2310_v52 }
  0x7a   : > { %v456_v2 = vld [vmem:[%s2222_s25 + $0x38] sm:$0x1]  ;;  %v457_v3 = vld [vmem:[%s2222_s25 + $0x3a] sm:$0x1]  ;;  %v458_v4 = vld [vmem:[%s2222_s25 + $0x3c] sm:$0x1]  ;;  %v2449_v55 = vadd.f32 %v455_v1, %v2325_v61 }
  0x7b   : > { %4255 = vst [vmem:[#allocation20_spill] sm:$0xff] %v2340_v5  ;;  %4256 = vst [vmem:[#allocation21_spill] sm:$0xff] %v2342_v6  ;;  %v2349_v9 = vld [vmem:[%s2215_s24 + $0x3e] sm:$0x1]  ;;  %v2352_v10 = vld [vmem:[%s2215_s24 + $0x1] sm:$0x1]  ;;  %v2452_v52 = vadd.f32 %v456_v2, %v2328_v62  ;;  %v2455_v56 = vadd.f32 %v457_v3, %v2331_v63 }
  0x7c   : > { %4257 = vst [vmem:[#allocation22_spill] sm:$0xff] %v2344_v7  ;;  %4258 = vst [vmem:[#allocation23_spill] sm:$0xff] %v2346_v8  ;;  %v2355_v11 = vld [vmem:[%s2215_s24 + $0x3] sm:$0x1]  ;;  %v2358_v12 = vld [vmem:[%s2215_s24 + $0x5] sm:$0x1] }
  0x7d   : > { %v459_v13 = vld [vmem:[%s2222_s25 + $0x3e] sm:$0x1]  ;;  %4259 = vst [vmem:[#allocation24_spill] sm:$0xff] %v2361_v14  ;;  %4260 = vst [vmem:[#allocation25_spill] sm:$0xff] %v2363_v15  ;;  %v492_v18 = vld [vmem:[%s2222_s25 + $0x1] sm:$0x1] }
  0x7e   : > { %4261 = vst [vmem:[#allocation26_spill] sm:$0xff] %v2365_v16  ;;  %4262 = vst [vmem:[#allocation27_spill] sm:$0xff] %v2367_v17  ;;  %v493_v19 = vld [vmem:[%s2222_s25 + $0x3] sm:$0x1]  ;;  %v494_v20 = vld [vmem:[%s2222_s25 + $0x5] sm:$0x1]  ;;  %v2469_v63 = vadd.f32 %v459_v13, %v2349_v9 }
  0x7f   : > { %v2373_v21 = vld [vmem:[%s2215_s24 + $0x7] sm:$0x1]  ;;  %v2376_v22 = vld [vmem:[%s2215_s24 + $0x9] sm:$0x1]  ;;  %v2379_v26 = vld [vmem:[%s2215_s24 + $0xb] sm:$0x1] }
  0x80   : > { %v2382_v23 = vld [vmem:[%s2215_s24 + $0xd] sm:$0x1]  ;;  %4263 = vst [vmem:[#allocation28_spill] sm:$0xff] %v2384_v24  ;;  %4264 = vst [vmem:[#allocation29_spill] sm:$0xff] %v2386_v25  ;;  %v495_v29 = vld [vmem:[%s2222_s25 + $0x7] sm:$0x1] }
  0x81   : > { %4265 = vst [vmem:[#allocation30_spill] sm:$0xff] %v2388_v27  ;;  %4266 = vst [vmem:[#allocation31_spill] sm:$0xff] %v2390_v28  ;;  %v496_v17 = vld [vmem:[%s2222_s25 + $0x9] sm:$0x1]  ;;  %v497_v16 = vld [vmem:[%s2222_s25 + $0xb] sm:$0x1] }
  0x82   : > { %v498_v15 = vld [vmem:[%s2222_s25 + $0xd] sm:$0x1]  ;;  %v2397_v30 = vld [vmem:[%s2215_s24 + $0xf] sm:$0x1]  ;;  %v2400_v34 = vld [vmem:[%s2215_s24 + $0x11] sm:$0x1] }
  0x83   : > { %v2403_v31 = vld [vmem:[%s2215_s24 + $0x13] sm:$0x1]  ;;  %v2406_v32 = vld [vmem:[%s2215_s24 + $0x15] sm:$0x1]  ;;  %4267 = vst [vmem:[#allocation32_spill] sm:$0xff] %v2409_v33  ;;  %4268 = vst [vmem:[#allocation33_spill] sm:$0xff] %v2412_v35 }
  0x84   : > { %4269 = vst [vmem:[#allocation34_spill] sm:$0xff] %v2415_v36  ;;  %4270 = vst [vmem:[#allocation35_spill] sm:$0xff] %v2418_v37  ;;  %v499_v28 = vld [vmem:[%s2222_s25 + $0xf] sm:$0x1]  ;;  %v500_v27 = vld [vmem:[%s2222_s25 + $0x11] sm:$0x1] }
  0x85   : > { %v501_v25 = vld [vmem:[%s2222_s25 + $0x13] sm:$0x1]  ;;  %v502_v38 = vld [vmem:[%s2222_s25 + $0x15] sm:$0x1]  ;;  %v407_v42 = vld [vmem:[%s2215_s24 + $0x17] sm:$0x1] }
  0x86   : > { %v408_v39 = vld [vmem:[%s2215_s24 + $0x19] sm:$0x1]  ;;  %v409_v43 = vld [vmem:[%s2215_s24 + $0x1b] sm:$0x1]  ;;  %v410_v35 = vld [vmem:[%s2215_s24 + $0x1d] sm:$0x1] }
  0x87   : > { %4271 = vst [vmem:[#allocation36_spill] sm:$0xff] %v2429_v40  ;;  %4272 = vst [vmem:[#allocation37_spill] sm:$0xff] %v2432_v41  ;;  %v503_v37 = vld [vmem:[%s2222_s25 + $0x17] sm:$0x1]  ;;  %v504_v36 = vld [vmem:[%s2222_s25 + $0x19] sm:$0x1] }
  0x88   : > { %4273 = vst [vmem:[#allocation38_spill] sm:$0xff] %v2435_v44  ;;  %4274 = vst [vmem:[#allocation39_spill] sm:$0xff] %v2438_v45  ;;  %v505_v33 = vld [vmem:[%s2222_s25 + $0x1b] sm:$0x1]  ;;  %v506_v49 = vld [vmem:[%s2222_s25 + $0x1d] sm:$0x1]  ;;  %v2458_v45 = vadd.f32 %v458_v4, %v2334_v0 }
  0x89   : > { %v411_v53 = vld [vmem:[%s2215_s24 + $0x1f] sm:$0x1]  ;;  %v412_v50 = vld [vmem:[%s2215_s24 + $0x21] sm:$0x1]  ;;  %v413_v54 = vld [vmem:[%s2215_s24 + $0x23] sm:$0x1] }
  0x8a   : > { %v414_v51 = vld [vmem:[%s2215_s24 + $0x25] sm:$0x1]  ;;  %4275 = vst [vmem:[#allocation40_spill] sm:$0xff] %v2449_v55  ;;  %4276 = vst [vmem:[#allocation41_spill] sm:$0xff] %v2452_v52  ;;  %v507_v44 = vld [vmem:[%s2222_s25 + $0x1f] sm:$0x1]  ;;  %v2479_v52 = vadd.f32 %v493_v19, %v2355_v11  ;;  %v2482_v55 = vadd.f32 %v494_v20, %v2358_v12  ;;  %v2493_v11 = vadd.f32 %v495_v29, %v2373_v21 }
  0x8b   : > { %4277 = vst [vmem:[#allocation42_spill] sm:$0xff] %v2455_v56  ;;  %4278 = vst [vmem:[#allocation43_spill] sm:$0xff] %v2458_v45  ;;  %v508_v41 = vld [vmem:[%s2222_s25 + $0x21] sm:$0x1]  ;;  %v509_v40 = vld [vmem:[%s2222_s25 + $0x23] sm:$0x1]  ;;  %v2476_v56 = vadd.f32 %v492_v18, %v2352_v10  ;;  %v2496_v12 = vadd.f32 %v496_v17, %v2376_v22  ;;  %v2499_v19 = vadd.f32 %v497_v16, %v2379_v26 }
  0x8c   : > { %v510_v24 = vld [vmem:[%s2222_s25 + $0x25] sm:$0x1]  ;;  %v415_v61 = vld [vmem:[%s2215_s24 + $0x27] sm:$0x1]  ;;  %v416_v1 = vld [vmem:[%s2215_s24 + $0x29] sm:$0x1]  ;;  %v2502_v20 = vadd.f32 %v498_v15, %v2382_v23  ;;  %v2513_v17 = vadd.f32 %v499_v28, %v2397_v30  ;;  %v2516_v16 = vadd.f32 %v500_v27, %v2400_v34  ;;  %v2519_v15 = vadd.f32 %v501_v25, %v2403_v31 }
  0x8d   : > { %v417_v62 = vld [vmem:[%s2215_s24 + $0x2b] sm:$0x1]  ;;  %v418_v2 = vld [vmem:[%s2215_s24 + $0x2d] sm:$0x1]  ;;  %4279 = vst [vmem:[#allocation44_spill] sm:$0xff] %v2469_v63  ;;  %4280 = vst [vmem:[#allocation45_spill] sm:$0xff] %v2476_v56  ;;  %v2522_v22 = vadd.f32 %v502_v38, %v2406_v32  ;;  %v2530_v28 = vadd.f32 %v505_v33, %v409_v43  ;;  %v2532_v27 = vadd.f32 %v506_v49, %v410_v35 }
  0x8e   : > { %v511_v0 = vld [vmem:[%s2222_s25 + $0x27] sm:$0x1]  ;;  %v512_v3 = vld [vmem:[%s2222_s25 + $0x29] sm:$0x1]  ;;  %v513_v4 = vld [vmem:[%s2222_s25 + $0x2b] sm:$0x1]  ;;  %v2537_v31 = vadd.f32 %v507_v44, %v411_v53  ;;  %v2539_v32 = vadd.f32 %v508_v41, %v412_v50  ;;  %v2541_v38 = vadd.f32 %v509_v40, %v413_v54 }
  0x8f   : > { %v514_v45 = vld [vmem:[%s2222_s25 + $0x2d] sm:$0x1]  ;;  %4281 = vst [vmem:[#allocation46_spill] sm:$0xff] %v2479_v52  ;;  %4282 = vst [vmem:[#allocation47_spill] sm:$0xff] %v2482_v55  ;;  %v419_v14 = vld [vmem:[%s2215_s24 + $0x2f] sm:$0x1]  ;;  %v2551_v43 = vadd.f32 %v512_v3, %v416_v1  ;;  %v2553_v44 = vadd.f32 %v513_v4, %v417_v62 }
  0x90   : > { %v420_v9 = vld [vmem:[%s2215_s24 + $0x31] sm:$0x1]  ;;  %v421_v13 = vld [vmem:[%s2215_s24 + $0x33] sm:$0x1]  ;;  %v422_v63 = vld [vmem:[%s2215_s24 + $0x35] sm:$0x1]  ;;  %v2555_v41 = vadd.f32 %v514_v45, %v418_v2 }
  0x91   : > { %v515_v8 = vld [vmem:[%s2222_s25 + $0x2f] sm:$0x1]  ;;  %v516_v10 = vld [vmem:[%s2222_s25 + $0x31] sm:$0x1]  ;;  %v517_v18 = vld [vmem:[%s2222_s25 + $0x33] sm:$0x1] }
  0x92   : > { %v518_v56 = vld [vmem:[%s2222_s25 + $0x35] sm:$0x1]  ;;  %4283 = vst [vmem:[#allocation48_spill] sm:$0xff] %v2493_v11  ;;  %4284 = vst [vmem:[#allocation49_spill] sm:$0xff] %v2499_v19  ;;  %v423_v55 = vld [vmem:[%s2215_s24 + $0x37] sm:$0x1]  ;;  %v2528_v19 = vadd.f32 %v504_v36, %v408_v39  ;;  %v2549_v39 = vadd.f32 %v511_v0, %v415_v61  ;;  %v2561_v50 = vadd.f32 %v515_v8, %v419_v14 }
  0x93   : > { %4285 = vst [vmem:[#allocation50_spill] sm:$0xff] %v2502_v20  ;;  %v424_v52 = vld [vmem:[%s2215_s24 + $0x39] sm:$0x1]  ;;  %v425_v7 = vld [vmem:[%s2215_s24 + $0x3b] sm:$0x1]  ;;  %v2526_v20 = vadd.f32 %v503_v37, %v407_v42  ;;  %v2543_v37 = vadd.f32 %v510_v24, %v414_v51  ;;  %v2563_v54 = vadd.f32 %v516_v10, %v420_v9  ;;  %v2565_v51 = vadd.f32 %v517_v18, %v421_v13  ;;  %s1602_s27 = sshll.u32 %s2006_s18, 9 }
  0x94   : > { %v426_v6 = vld [vmem:[%s2215_s24 + $0x3d] sm:$0x1]  ;;  %v519_v5 = vld [vmem:[%s2222_s25 + $0x37] sm:$0x1]  ;;  %v520_v21 = vld [vmem:[%s2222_s25 + $0x39] sm:$0x1]  ;;  %v2567_v61 = vadd.f32 %v518_v56, %v422_v63  ;;  %s4037_s12 = scalar_lea.hbm %s4094_s4, %s1602_s27 }
  0x95   : > { %v521_v29 = vld [vmem:[%s2222_s25 + $0x3b] sm:$0x1]  ;;  %v522_v11 = vld [vmem:[%s2222_s25 + $0x3d] sm:$0x1]  ;;  %v427_v26 = vld [vmem:[%s2215_s24 + $0x3f] sm:$0x1]  ;;  %v2573_v0 = vadd.f32 %v519_v5, %v423_v55  ;;  %v2575_v3 = vadd.f32 %v520_v21, %v424_v52 }
  0x96   : > { %v523_v23 = vld [vmem:[%s2222_s25 + $0x3f] sm:$0x1]  ;;  %v556_v30 = vld [vmem:[%s2229_s26] sm:$0x1]  ;;  %v557_v25 = vld [vmem:[%s2229_s26 + $0x2] sm:$0x1]  ;;  %v2577_v8 = vadd.f32 %v521_v29, %v425_v7  ;;  %v2579_v14 = vadd.f32 %v522_v11, %v426_v6 }
  0x97   : > { %v558_v34 = vld [vmem:[%s2229_s26 + $0x4] sm:$0x1]  ;;  %v559_v36 = vld [vmem:[%s2229_s26 + $0x6] sm:$0x1]  ;;  %v560_v33 = vld [vmem:[%s2229_s26 + $0x8] sm:$0x1]  ;;  %v2585_v13 = vadd.f32 %v523_v23, %v427_v26  ;;  %v2592_v18 = vadd.f32 %v556_v30, %v2294_v46  ;;  %v2595_v7 = vadd.f32 %v557_v25, %v2296_v47 }
  0x98   : > { %v561_v35 = vld [vmem:[%s2229_s26 + $0xa] sm:$0x1]  ;;  %v562_v42 = vld [vmem:[%s2229_s26 + $0xc] sm:$0x1]  ;;  %v563_v40 = vld [vmem:[%s2229_s26 + $0xe] sm:$0x1]  ;;  %v2598_v6 = vadd.f32 %v558_v34, %v2298_v48  ;;  %v2604_v26 = vadd.f32 %v559_v36, %v2316_v57  ;;  %v2607_v23 = vadd.f32 %v560_v33, %v2318_v58 }
  0x99   : > { %v564_v24 = vld [vmem:[%s2229_s26 + $0x10] sm:$0x1]  ;;  %v565_v49 = vld [vmem:[%s2229_s26 + $0x12] sm:$0x1]  ;;  %v566_v53 = vld [vmem:[%s2229_s26 + $0x14] sm:$0x1]  ;;  %v2610_v46 = vadd.f32 %v561_v35, %v2320_v59  ;;  %v2613_v47 = vadd.f32 %v562_v42, %v2322_v60 }
  0x9a   : > { %4286 = vst [vmem:[#allocation51_spill] sm:$0xff] %v2563_v54  ;;  %4287 = vst [vmem:[#allocation52_spill] sm:$0xff] %v2565_v51  ;;  %v567_v45 = vld [vmem:[%s2229_s26 + $0x16] sm:$0x1]  ;;  %v568_v1 = vld [vmem:[%s2229_s26 + $0x18] sm:$0x1] }
  0x9b   : > { %4288 = vst [vmem:[#allocation53_spill] sm:$0xff] %v2567_v61  ;;  %v569_v62 = vld [vmem:[%s2229_s26 + $0x1a] sm:$0x1]  ;;  %v570_v2 = vld [vmem:[%s2229_s26 + $0x1c] sm:$0x1]  ;;  %4289 = vst [vmem:[#allocation54_spill] sm:$0xff] %v2573_v0 }
  0x9c   : > { %4290 = vst [vmem:[#allocation55_spill] sm:$0xff] %v2575_v3  ;;  %4291 = vst [vmem:[#allocation56_spill] sm:$0xff] %v2577_v8  ;;  %v571_v4 = vld [vmem:[%s2229_s26 + $0x1e] sm:$0x1]  ;;  %v572_v56 = vld [vmem:[%s2229_s26 + $0x20] sm:$0x1] }
  0x9d   : > { %4292 = vst [vmem:[#allocation57_spill] sm:$0xff] %v2579_v14  ;;  %v573_v63 = vld [vmem:[%s2229_s26 + $0x22] sm:$0x1]  ;;  %v574_v9 = vld [vmem:[%s2229_s26 + $0x24] sm:$0x1]  ;;  %4293 = vst [vmem:[#allocation58_spill] sm:$0xff] %v2585_v13 }
  0x9e   : > { %v575_v10 = vld [vmem:[%s2229_s26 + $0x26] sm:$0x1]  ;;  %v576_v5 = vld [vmem:[%s2229_s26 + $0x28] sm:$0x1]  ;;  %v577_v55 = vld [vmem:[%s2229_s26 + $0x2a] sm:$0x1] }
  0x9f   : > { %v578_v52 = vld [vmem:[%s2229_s26 + $0x2c] sm:$0x1]  ;;  %v579_v11 = vld [vmem:[%s2229_s26 + $0x2e] sm:$0x1]  ;;  %v580_v21 = vld [vmem:[%s2229_s26 + $0x30] sm:$0x1] }
  0xa0   : > { %v581_v29 = vld [vmem:[%s2229_s26 + $0x32] sm:$0x1]  ;;  %v582_v30 = vld [vmem:[%s2229_s26 + $0x34] sm:$0x1]  ;;  %v583_v48 = vld [vmem:[%s2229_s26 + $0x36] sm:$0x1] }
  0xa1   : > { %v584_v25 = vld [vmem:[%s2229_s26 + $0x38] sm:$0x1]  ;;  %v4294_v34 = vld [vmem:[#allocation20_spill] sm:$0xff]  ;;  %v4295_v14 = vld [vmem:[#allocation21_spill] sm:$0xff]  ;;  %s1414_s10 = sshll.u32 %s4005_s21, 4  ;;  %s1400_s18 = scalar_lea.sflag [#allocation4], %s2211_s5  ;;  %s4040_s10 = int_to_ptr.vmem [resolvable:$true] %s1414_s10 }
  0xa2   : > { %v2619_v13 = vadd.f32 %v563_v40, %v4294_v34  ;;  %v2622_v57 = vadd.f32 %v564_v24, %v4295_v14  ;;  %v4296_v36 = vld [vmem:[#allocation22_spill] sm:$0xff]  ;;  %v4297_v59 = vld [vmem:[#allocation23_spill] sm:$0xff]  ;;  %v4298_v8 = vld [vmem:[#allocation24_spill] sm:$0xff]  ;;  %s1926_s7 = scalar_lea.vmem %s4040_s10, 512  ;;  %s2024_s1 = smov [#allocation10]  }
  0xa3   : > { %v2625_v58 = vadd.f32 %v565_v49, %v4296_v36  ;;  %v2628_v33 = vadd.f32 %v566_v53, %v4297_v59  ;;  %v585_v60 = vld [vmem:[%s2229_s26 + $0x3a] sm:$0x1]  ;;  %v586_v35 = vld [vmem:[%s2229_s26 + $0x3c] sm:$0x1]  ;;  %v587_v42 = vld [vmem:[%s2229_s26 + $0x3e] sm:$0x1]  ;;  %v2634_v3 = vadd.f32 %v567_v45, %v4298_v8  ;;  %p1927_p8 = scmp.ne.s32.totalorder %s4040_s10, %s1926_s7 }
  0xa4   : > { %v4299_v40 = vld [vmem:[#allocation25_spill] sm:$0xff]  ;;  %v4300_v24 = vld [vmem:[#allocation26_spill] sm:$0xff]  ;;  %v4301_v49 = vld [vmem:[#allocation27_spill] sm:$0xff]  ;;  %s1930_s30 = sshll.u32 %s2024_s1, 4  ;;  %s1931_s30 = int_to_ptr.vmem [resolvable:$false] %s1930_s30 }
  0xa5   : > { %v2637_v34 = vadd.f32 %v568_v1, %v4299_v40  ;;  %v2640_v14 = vadd.f32 %v569_v62, %v4300_v24  ;;  %v2643_v36 = vadd.f32 %v570_v2, %v4301_v49  ;;  %v4302_v53 = vld [vmem:[#allocation28_spill] sm:$0xff]  ;;  %v4303_v0 = vld [vmem:[#allocation29_spill] sm:$0xff]  ;;  %v4304_v51 = vld [vmem:[#allocation30_spill] sm:$0xff]  ;;  %p1928_p0 = pnand %p1927_p8, %p2107_p9  ;;  %s1932_s17 = scalar_lea.vmem %s1931_s30, 1024 }
  0xa6   : > { %v2646_v59 = vadd.f32 %v571_v4, %v4302_v53  ;;  %v2649_v61 = vadd.f32 %v572_v56, %v4303_v0  ;;  %v2652_v45 = vadd.f32 %v573_v63, %v4304_v51  ;;  %v4306_v8 = vld [vmem:[#allocation31_spill] sm:$0xff]  ;;  %v620_v40 = vld [vmem:[%s2229_s26 + $0x1] sm:$0x1]  ;;  %v621_v62 = vld [vmem:[%s2229_s26 + $0x3] sm:$0x1]  ;;  %p1933_p4 = scmp.lt.s32.totalorder %s4040_s10, %s1931_s30  ;;  %p1934_p7 = scmp.lt.s32.totalorder %s1932_s17, %s1926_s7 }
  0xa7   : > { %v2655_v1 = vadd.f32 %v574_v9, %v4306_v8  ;;  %v622_v24 = vld [vmem:[%s2229_s26 + $0x5] sm:$0x1]  ;;  %v4309_v4 = vld [vmem:[#allocation33_spill] sm:$0xff]  ;;  %v4311_v0 = vld [vmem:[#allocation34_spill] sm:$0xff]  ;;  %p1929_p3 = pneg %p1928_p0 }
  0xa8   : > { %4305 = vst [vmem:[#allocation20_spill] sm:$0xff] %v2652_v45  ;;  %v4308_v2 = vld [vmem:[#allocation32_spill] sm:$0xff]  ;;  %v2664_v53 = vadd.f32 %v576_v5, %v4309_v4  ;;  %v2667_v56 = vadd.f32 %v577_v55, %v4311_v0  ;;  %v4313_v51 = vld [vmem:[#allocation35_spill] sm:$0xff]  ;;  %v624_v8 = vld [vmem:[%s2229_s26 + $0x9] sm:$0x1]  ;;  %p1935_p10 = por %p1934_p7, %p1933_p4 }
  0xa9   : > { %4307 = vst [vmem:[#allocation21_spill] sm:$0xff] %v2655_v1  ;;  %v2661_v49 = vadd.f32 %v575_v10, %v4308_v2  ;;  %v2670_v63 = vadd.f32 %v578_v52, %v4313_v51  ;;  %v623_v9 = vld [vmem:[%s2229_s26 + $0x7] sm:$0x1]  ;;  %v625_v54 = vld [vmem:[%s2229_s26 + $0xb] sm:$0x1]  ;;  %v4319_v2 = vld [vmem:[#allocation38_spill] sm:$0xff] }
  0xaa   : > { %4310 = vst [vmem:[#allocation22_spill] sm:$0xff] %v2664_v53  ;;  %4312 = vst [vmem:[#allocation23_spill] sm:$0xff] %v2667_v56  ;;  %v4315_v1 = vld [vmem:[#allocation36_spill] sm:$0xff]  ;;  %v4317_v10 = vld [vmem:[#allocation37_spill] sm:$0xff]  ;;  %v2682_v55 = vadd.f32 %v581_v29, %v4319_v2  ;;  %p1936_p13 = pnand %p1935_p10, %p1929_p3 }
  0xab   : > { %4314 = vst [vmem:[#allocation24_spill] sm:$0xff] %v2670_v63  ;;  %v2676_v45 = vadd.f32 %v579_v11, %v4315_v1  ;;  %v2679_v5 = vadd.f32 %v580_v21, %v4317_v10  ;;  %v4321_v4 = vld [vmem:[#allocation39_spill] sm:$0xff]  ;;  %v626_v0 = vld [vmem:[%s2229_s26 + $0xd] sm:$0x1]  ;;  %v627_v51 = vld [vmem:[%s2229_s26 + $0xf] sm:$0x1] }
  0xac   : > { %4320 = vst [vmem:[#allocation27_spill] sm:$0xff] %v2682_v55  ;;  %v2685_v52 = vadd.f32 %v582_v30, %v4321_v4  ;;  %v628_v63 = vld [vmem:[%s2229_s26 + $0x11] sm:$0x1]  ;;  %v4323_v56 = vld [vmem:[#allocation40_spill] sm:$0xff]  ;;  %v4325_v11 = vld [vmem:[#allocation41_spill] sm:$0xff] }
  0xad   : > { %4316 = vst [vmem:[#allocation25_spill] sm:$0xff] %v2676_v45  ;;  %4318 = vst [vmem:[#allocation26_spill] sm:$0xff] %v2679_v5  ;;  %v2691_v53 = vadd.f32 %v583_v48, %v4323_v56  ;;  %v2694_v1 = vadd.f32 %v584_v25, %v4325_v11  ;;  %v4327_v21 = vld [vmem:[#allocation42_spill] sm:$0xff]  ;;  %v4329_v29 = vld [vmem:[#allocation43_spill] sm:$0xff] }
  0xae   : > { %4322 = vst [vmem:[#allocation28_spill] sm:$0xff] %v2685_v52  ;;  %v2697_v10 = vadd.f32 %v585_v60, %v4327_v21  ;;  %v2700_v2 = vadd.f32 %v586_v35, %v4329_v29  ;;  %v629_v30 = vld [vmem:[%s2229_s26 + $0x13] sm:$0x1]  ;;  %v630_v4 = vld [vmem:[%s2229_s26 + $0x15] sm:$0x1]  ;;  %v4331_v55 = vld [vmem:[#allocation44_spill] sm:$0xff] }
  0xaf   : > { %4324 = vst [vmem:[#allocation29_spill] sm:$0xff] %v2691_v53  ;;  %4326 = vst [vmem:[#allocation30_spill] sm:$0xff] %v2694_v1  ;;  %v631_v52 = vld [vmem:[%s2229_s26 + $0x17] sm:$0x1]  ;;  %v2706_v5 = vadd.f32 %v587_v42, %v4331_v55  ;;  %v632_v45 = vld [vmem:[%s2229_s26 + $0x19] sm:$0x1]  ;;  %v2727_v55 = vadd.f32 %v624_v8, %v2496_v12  ;;  %v2746_v12 = vadd.f32 %v630_v4, %v2522_v22 }
  0xb0   : > { %4328 = vst [vmem:[#allocation31_spill] sm:$0xff] %v2697_v10  ;;  %4330 = vst [vmem:[#allocation32_spill] sm:$0xff] %v2700_v2  ;;  %v633_v48 = vld [vmem:[%s2229_s26 + $0x1b] sm:$0x1]  ;;  %v634_v56 = vld [vmem:[%s2229_s26 + $0x1d] sm:$0x1] }
  0xb1   : > { %4332 = vst [vmem:[#allocation33_spill] sm:$0xff] %v2706_v5  ;;  %v4333_v53 = vld [vmem:[#allocation45_spill] sm:$0xff]  ;;  %v4334_v11 = vld [vmem:[#allocation46_spill] sm:$0xff]  ;;  %v4335_v35 = vld [vmem:[#allocation47_spill] sm:$0xff] }
  0xb2   : > { %v2712_v25 = vadd.f32 %v620_v40, %v4333_v53  ;;  %v2715_v60 = vadd.f32 %v621_v62, %v4334_v11  ;;  %v2718_v21 = vadd.f32 %v622_v24, %v4335_v35  ;;  %v635_v29 = vld [vmem:[%s2229_s26 + $0x1f] sm:$0x1]  ;;  %v636_v2 = vld [vmem:[%s2229_s26 + $0x21] sm:$0x1]  ;;  %v637_v10 = vld [vmem:[%s2229_s26 + $0x23] sm:$0x1]  ;;  %v2737_v24 = vadd.f32 %v627_v51, %v2513_v17 }
  0xb3   : > { %v4336_v1 = vld [vmem:[#allocation48_spill] sm:$0xff]  ;;  %v4337_v40 = vld [vmem:[#allocation49_spill] sm:$0xff]  ;;  %v4338_v5 = vld [vmem:[#allocation50_spill] sm:$0xff]  ;;  %v2740_v35 = vadd.f32 %v628_v63, %v2516_v16  ;;  %v2757_v17 = vadd.f32 %v633_v48, %v2530_v28  ;;  %v2760_v16 = vadd.f32 %v634_v56, %v2532_v27  ;;  %v2765_v22 = vadd.f32 %v635_v29, %v2537_v31 }
  0xb4   : > { %v2724_v42 = vadd.f32 %v623_v9, %v4336_v1  ;;  %v2730_v53 = vadd.f32 %v625_v54, %v4337_v40  ;;  %v2733_v62 = vadd.f32 %v626_v0, %v4338_v5  ;;  %v638_v11 = vld [vmem:[%s2229_s26 + $0x25] sm:$0x1]  ;;  %v2743_v9 = vadd.f32 %v629_v30, %v2519_v15  ;;  %v639_v8 = vld [vmem:[%s2229_s26 + $0x27] sm:$0x1]  ;;  %v640_v54 = vld [vmem:[%s2229_s26 + $0x29] sm:$0x1] }
  0xb5   : > { %v2751_v5 = vadd.f32 %v631_v52, %v2526_v20  ;;  %v2754_v0 = vadd.f32 %v632_v45, %v2528_v19  ;;  %v641_v15 = vld [vmem:[%s2229_s26 + $0x2b] sm:$0x1]  ;;  %v642_v63 = vld [vmem:[%s2229_s26 + $0x2d] sm:$0x1]  ;;  %v2768_v51 = vadd.f32 %v636_v2, %v2539_v32  ;;  %v2771_v20 = vadd.f32 %v637_v10, %v2541_v38  ;;  %v643_v28 = vld [vmem:[%s2229_s26 + $0x2f] sm:$0x1] }
  0xb6   : > { %v2774_v19 = vmul.f32 0.33333334, %v2592_v18  ;;  %v2778_v27 = vadd.f32 %v638_v11, %v2543_v37  ;;  %v2781_v45 = vmul.f32 0.33333334, %v2595_v7  ;;  %v2784_v31 = vmul.f32 0.33333334, %v2598_v6 }
  0xb7   : > { %v2787_v32 = vmul.f32 0.33333334, %v2604_v26  ;;  %v644_v38 = vld [vmem:[%s2229_s26 + $0x31] sm:$0x1]  ;;  %v2791_v52 = vadd.f32 %v639_v8, %v2549_v39  ;;  %v2794_v18 = vmul.f32 0.33333334, %v2607_v23  ;;  %v2804_v1 = vadd.f32 %v640_v54, %v2551_v43 }
  0xb8   : > { %4339 = vst [vmem:[#allocation34_spill] sm:$0xff] %v2774_v19  ;;  %4340 = vst [vmem:[#allocation35_spill] sm:$0xff] %v2781_v45  ;;  %v2797_v37 = vmul.f32 0.33333334, %v2610_v46  ;;  %v2800_v7 = vmul.f32 0.33333334, %v2613_v47  ;;  %v2817_v10 = vadd.f32 %v641_v15, %v2553_v44  ;;  %v2830_v2 = vadd.f32 %v642_v63, %v2555_v41 }
  0xb9   : > { %4341 = vst [vmem:[#allocation36_spill] sm:$0xff] %v2784_v31  ;;  %4342 = vst [vmem:[#allocation37_spill] sm:$0xff] %v2787_v32  ;;  %v645_v6 = vld [vmem:[%s2229_s26 + $0x33] sm:$0x1]  ;;  %v2807_v26 = vmul.f32 0.33333334, %v2619_v13  ;;  %v2843_v30 = vadd.f32 %v643_v28, %v2561_v50 }
  0xba   : > { %4343 = vst [vmem:[#allocation38_spill] sm:$0xff] %v2794_v18  ;;  %4344 = vst [vmem:[#allocation39_spill] sm:$0xff] %v2797_v37  ;;  %v2810_v39 = vmul.f32 0.33333334, %v2622_v57  ;;  %v2813_v23 = vmul.f32 0.33333334, %v2625_v58 }
  0xbb   : > { %4345 = vst [vmem:[#allocation40_spill] sm:$0xff] %v2800_v7  ;;  %4346 = vst [vmem:[#allocation41_spill] sm:$0xff] %v2807_v26  ;;  %v646_v46 = vld [vmem:[%s2229_s26 + $0x35] sm:$0x1]  ;;  %v2820_v47 = vmul.f32 0.33333334, %v2628_v33 }
  0xbc   : > { %4347 = vst [vmem:[#allocation42_spill] sm:$0xff] %v2810_v39  ;;  %4348 = vst [vmem:[#allocation43_spill] sm:$0xff] %v2813_v23  ;;  %v2823_v43 = vmul.f32 0.33333334, %v2634_v3  ;;  %v2826_v13 = vmul.f32 0.33333334, %v2637_v34 }
  0xbd   : > { %4349 = vst [vmem:[#allocation44_spill] sm:$0xff] %v2820_v47  ;;  %v647_v57 = vld [vmem:[%s2229_s26 + $0x37] sm:$0x1]  ;;  %v2833_v58 = vmul.f32 0.33333334, %v2640_v14  ;;  %v4356_v4 = vld [vmem:[#allocation20_spill] sm:$0xff] }
  0xbe   : > { %4350 = vst [vmem:[#allocation45_spill] sm:$0xff] %v2823_v43  ;;  %4351 = vst [vmem:[#allocation46_spill] sm:$0xff] %v2826_v13  ;;  %v2836_v44 = vmul.f32 0.33333334, %v2643_v36  ;;  %v2839_v33 = vmul.f32 0.33333334, %v2646_v59 }
  0xbf   : > { %4352 = vst [vmem:[#allocation47_spill] sm:$0xff] %v2833_v58  ;;  %v648_v3 = vld [vmem:[%s2229_s26 + $0x39] sm:$0x1]  ;;  %v2846_v34 = vmul.f32 0.33333334, %v2649_v61  ;;  %v4358_v48 = vld [vmem:[#allocation21_spill] sm:$0xff] }
  0xc0   : > { %4353 = vst [vmem:[#allocation48_spill] sm:$0xff] %v2836_v44  ;;  %4354 = vst [vmem:[#allocation49_spill] sm:$0xff] %v2839_v33  ;;  %v2849_v41 = vmul.f32 0.33333334, %v4356_v4  ;;  %v2852_v14 = vmul.f32 0.33333334, %v4358_v48 }
  0xc1   : > { %4355 = vst [vmem:[#allocation50_spill] sm:$0xff] %v2846_v34  ;;  %v649_v56 = vld [vmem:[%s2229_s26 + $0x3b] sm:$0x1]  ;;  %v2859_v59 = vmul.f32 0.33333334, %v2661_v49  ;;  %v4362_v40 = vld [vmem:[#allocation22_spill] sm:$0xff] }
  0xc2   : > { %4357 = vst [vmem:[#allocation20_spill] sm:$0xff] %v2849_v41  ;;  %4359 = vst [vmem:[#allocation21_spill] sm:$0xff] %v2852_v14  ;;  %v4360_v36 = vld [vmem:[#allocation51_spill] sm:$0xff]  ;;  %v2862_v11 = vmul.f32 0.33333334, %v4362_v40  ;;  %v4366_v54 = vld [vmem:[#allocation52_spill] sm:$0xff] }
  0xc3   : > { %v2856_v29 = vadd.f32 %v644_v38, %v4360_v36  ;;  %4361 = vst [vmem:[#allocation51_spill] sm:$0xff] %v2859_v59  ;;  %v4364_v50 = vld [vmem:[#allocation23_spill] sm:$0xff]  ;;  %v2869_v15 = vadd.f32 %v645_v6, %v4366_v54  ;;  %v4367_v63 = vld [vmem:[#allocation24_spill] sm:$0xff]  ;;  %v4369_v4 = vld [vmem:[#allocation25_spill] sm:$0xff]  ;;  %v2889_v6 = vmul.f32 0.33333334, %v2718_v21 }
  0xc4   : > { %4363 = vst [vmem:[#allocation22_spill] sm:$0xff] %v2862_v11  ;;  %v2865_v8 = vmul.f32 0.33333334, %v4364_v50  ;;  %v650_v61 = vld [vmem:[%s2229_s26 + $0x3d] sm:$0x1]  ;;  %v4371_v38 = vld [vmem:[#allocation26_spill] sm:$0xff] }
  0xc5   : > { %v2872_v28 = vmul.f32 0.33333334, %v4367_v63  ;;  %v2875_v48 = vmul.f32 0.33333334, %v4369_v4  ;;  %v2878_v36 = vmul.f32 0.33333334, %v4371_v38 }
  0xc6   : > { %4365 = vst [vmem:[#allocation23_spill] sm:$0xff] %v2865_v8  ;;  %v651_v49 = vld [vmem:[%s2229_s26 + $0x3f] sm:$0x1]  ;;  %v4373_v59 = vld [vmem:[#allocation53_spill] sm:$0xff]  ;;  %v2883_v11 = vmul.f32 0.33333334, %v2712_v25 }
  0xc7   : > { %4368 = vst [vmem:[#allocation52_spill] sm:$0xff] %v2872_v28  ;;  %4370 = vst [vmem:[#allocation24_spill] sm:$0xff] %v2875_v48  ;;  %v678_v40 = vadd.f32 %v646_v46, %v4373_v59  ;;  %v2886_v50 = vmul.f32 0.33333334, %v2715_v60  ;;  %v4376_v54 = vld [vmem:[#allocation54_spill] sm:$0xff]  ;;  %v4377_v28 = vld [vmem:[#allocation27_spill] sm:$0xff] }
  0xc8   : > { %4372 = vst [vmem:[#allocation25_spill] sm:$0xff] %v2878_v36  ;;  %4375 = vst [vmem:[#allocation53_spill] sm:$0xff] %v2889_v6  ;;  %v679_v63 = vadd.f32 %v647_v57, %v4376_v54  ;;  %v2893_v4 = vmul.f32 0.33333334, %v4377_v28  ;;  %v4379_v48 = vld [vmem:[#allocation28_spill] sm:$0xff]  ;;  %v4382_v46 = vld [vmem:[#allocation55_spill] sm:$0xff] }
  0xc9   : > { %4374 = vst [vmem:[#allocation26_spill] sm:$0xff] %v2886_v50  ;;  %v2896_v38 = vmul.f32 0.33333334, %v4379_v48  ;;  %v2899_v36 = vmul.f32 0.33333334, %v2724_v42  ;;  %v680_v25 = vadd.f32 %v648_v3, %v4382_v46  ;;  %v4383_v59 = vld [vmem:[#allocation29_spill] sm:$0xff] }
  0xca   : > { %4378 = vst [vmem:[#allocation54_spill] sm:$0xff] %v2893_v4  ;;  %v2903_v8 = vmul.f32 0.33333334, %v4383_v59  ;;  %v4385_v60 = vld [vmem:[#allocation30_spill] sm:$0xff]  ;;  %v2909_v21 = vmul.f32 0.33333334, %v2727_v55 }
  0xcb   : > { %4380 = vst [vmem:[#allocation27_spill] sm:$0xff] %v2896_v38  ;;  %4381 = vst [vmem:[#allocation28_spill] sm:$0xff] %v2899_v36  ;;  %v2906_v14 = vmul.f32 0.33333334, %v4385_v60  ;;  %v4388_v57 = vld [vmem:[#allocation56_spill] sm:$0xff]  ;;  %v4389_v54 = vld [vmem:[#allocation31_spill] sm:$0xff] }
  0xcc   : > { %4384 = vst [vmem:[#allocation55_spill] sm:$0xff] %v2903_v8  ;;  %4387 = vst [vmem:[#allocation30_spill] sm:$0xff] %v2909_v21  ;;  %v681_v28 = vadd.f32 %v649_v56, %v4388_v57  ;;  %v2913_v4 = vmul.f32 0.33333334, %v4389_v54  ;;  %v2916_v48 = vmul.f32 0.33333334, %v2730_v53 }
  0xcd   : > { %4386 = vst [vmem:[#allocation29_spill] sm:$0xff] %v2906_v14  ;;  %v2919_v42 = vmul.f32 0.33333334, %v2733_v62  ;;  %v4393_v3 = vld [vmem:[#allocation57_spill] sm:$0xff]  ;;  %v780_v59 = vmul.f32 1.442695, %v2883_v11 }
  0xce   : > { %4390 = vst [vmem:[#allocation56_spill] sm:$0xff] %v2913_v4  ;;  %4391 = vst [vmem:[#allocation31_spill] sm:$0xff] %v2916_v48  ;;  %v682_v46 = vadd.f32 %v650_v61, %v4393_v3  ;;  %v782_v60 = vmul.f32 1.442695, %v2886_v50  ;;  %v784_v55 = vmul.f32 1.442695, %v2889_v6 }
  0xcf   : > { %4392 = vst [vmem:[#allocation59_spill] sm:$0xff] %v2919_v42  ;;  %v4394_v14 = vld [vmem:[#allocation58_spill] sm:$0xff]  ;;  %v4395_v56 = vld [vmem:[#allocation32_spill] sm:$0xff]  ;;  %v2930_v54 = vmul.f32 0.33333334, %v2737_v24  ;;  %v4398_v62 = vld [vmem:[#allocation33_spill] sm:$0xff]  ;;  %1686 = vpow2.f32 %v780_v59 }
  0xd0   : > { %v683_v8 = vadd.f32 %v651_v49, %v4394_v14  ;;  %v2927_v57 = vmul.f32 0.33333334, %v4395_v56  ;;  %v786_v53 = vmul.f32 1.442695, %v2899_v36  ;;  %v2934_v4 = vmul.f32 0.33333334, %v4398_v62 }
  0xd1   : > { %4397 = vst [vmem:[#allocation58_spill] sm:$0xff] %v2930_v54  ;;  %v2937_v61 = vmul.f32 0.33333334, %v2740_v35  ;;  %v788_v3 = vmul.f32 1.442695, %v2909_v21  ;;  %1688 = vpow2.f32 %v782_v60  ;;  %v3050_v23 = vld [vmem:[%s2234_s29 + $0x8] sm:$0xff] }
  0xd2   : > { %4396 = vst [vmem:[#allocation57_spill] sm:$0xff] %v2927_v57  ;;  %4399 = vst [vmem:[#allocation32_spill] sm:$0xff] %v2934_v4  ;;  %v2941_v38 = vmul.f32 0.33333334, %v2743_v9  ;;  %v2944_v14 = vmul.f32 0.33333334, %v2746_v12  ;;  %1690 = vpow2.f32 %v784_v55 }
  0xd3   : > { %4400 = vst [vmem:[#allocation33_spill] sm:$0xff] %v2937_v61  ;;  %v790_v24 = vmul.f32 1.442695, %v2916_v48  ;;  %v2948_v49 = vmul.f32 0.33333334, %v2751_v5  ;;  %1692 = vpow2.f32 %v786_v53  ;;  %4425 = vst [vmem:[#allocation84_spill] sm:$0xff] %v3050_v23 }
  0xd4   : > { %4401 = vst [vmem:[#allocation60_spill] sm:$0xff] %v2941_v38  ;;  %4402 = vst [vmem:[#allocation61_spill] sm:$0xff] %v2944_v14  ;;  %v2951_v56 = vmul.f32 0.33333334, %v2754_v0  ;;  %v792_v35 = vmul.f32 1.442695, %v2919_v42  ;;  %1694 = vpow2.f32 %v788_v3 }
  0xd5   : > { %4403 = vst [vmem:[#allocation62_spill] sm:$0xff] %v2948_v49  ;;  %v2955_v59 = vmul.f32 0.33333334, %v2757_v17  ;;  %v2958_v9 = vmul.f32 0.33333334, %v2760_v16  ;;  %1696 = vpow2.f32 %v790_v24  ;;  %v4446_v42 = vmov 0 }
  0xd6   : > { %4404 = vst [vmem:[#allocation63_spill] sm:$0xff] %v2951_v56  ;;  %v794_v12 = vmul.f32 1.442695, %v2930_v54  ;;  %v2962_v60 = vmul.f32 0.33333334, %v2765_v22  ;;  %1698 = vpow2.f32 %v792_v35 }
  0xd7   : > { %4405 = vst [vmem:[#allocation64_spill] sm:$0xff] %v2955_v59  ;;  %4406 = vst [vmem:[#allocation65_spill] sm:$0xff] %v2958_v9  ;;  %v2965_v5 = vmul.f32 0.33333334, %v2768_v51  ;;  %v796_v0 = vmul.f32 1.442695, %v2937_v61 }
  0xd8   : > { %4407 = vst [vmem:[#allocation66_spill] sm:$0xff] %v2962_v60  ;;  %v2969_v55 = vmul.f32 0.33333334, %v2771_v20  ;;  %v2972_v17 = vmul.f32 0.33333334, %v2778_v27  ;;  %1700 = vpow2.f32 %v794_v12 }
  0xd9   : > { %4408 = vst [vmem:[#allocation67_spill] sm:$0xff] %v2965_v5  ;;  %v798_v16 = vmul.f32 1.442695, %v2941_v38  ;;  %v2976_v53 = vmul.f32 0.33333334, %v2791_v52  ;;  %1702 = vpow2.f32 %v796_v0 }
  0xda   : > { %4409 = vst [vmem:[#allocation68_spill] sm:$0xff] %v2969_v55  ;;  %4410 = vst [vmem:[#allocation69_spill] sm:$0xff] %v2972_v17  ;;  %v2979_v22 = vmul.f32 0.33333334, %v2804_v1  ;;  %v800_v51 = vmul.f32 1.442695, %v2944_v14 }
  0xdb   : > { %4411 = vst [vmem:[#allocation70_spill] sm:$0xff] %v2976_v53  ;;  %v2983_v62 = vmul.f32 0.33333334, %v2817_v10  ;;  %v2986_v20 = vmul.f32 0.33333334, %v2830_v2  ;;  %1704 = vpow2.f32 %v798_v16  ;;  %v3017_v16 = vld [vmem:[%s2234_s29] sm:$0xff] }
  0xdc   : > { %4412 = vst [vmem:[#allocation71_spill] sm:$0xff] %v2979_v22  ;;  %v802_v27 = vmul.f32 1.442695, %v2948_v49  ;;  %v2990_v3 = vmul.f32 0.33333334, %v2843_v30  ;;  %1706 = vpow2.f32 %v800_v51  ;;  %4424 = vst [vmem:[#allocation83_spill] sm:$0xff] %v3017_v16 }
  0xdd   : > { %4413 = vst [vmem:[#allocation72_spill] sm:$0xff] %v2983_v62  ;;  %4414 = vst [vmem:[#allocation73_spill] sm:$0xff] %v2986_v20  ;;  %v2993_v52 = vmul.f32 0.33333334, %v2856_v29  ;;  %v804_v1 = vmul.f32 1.442695, %v2951_v56 }
  0xde   : > { %4415 = vst [vmem:[#allocation74_spill] sm:$0xff] %v2990_v3  ;;  %v2997_v24 = vmul.f32 0.33333334, %v2869_v15  ;;  %v2999_v10 = vmul.f32 0.33333334, %v678_v40  ;;  %1708 = vpow2.f32 %v802_v27  ;;  %v4432_v56 = vmov 0 }
  0xdf   : > { %4416 = vst [vmem:[#allocation75_spill] sm:$0xff] %v2993_v52  ;;  %v806_v2 = vmul.f32 1.442695, %v2955_v59  ;;  %v3002_v35 = vmul.f32 0.33333334, %v679_v63  ;;  %1710 = vpow2.f32 %v804_v1 }
  0xe0   : > { %4417 = vst [vmem:[#allocation76_spill] sm:$0xff] %v2997_v24  ;;  %4418 = vst [vmem:[#allocation77_spill] sm:$0xff] %v2999_v10  ;;  %v3004_v12 = vmul.f32 0.33333334, %v680_v25  ;;  %v808_v30 = vmul.f32 1.442695, %v2958_v9  ;;  %v3019_v25 = vpop.eup %1686 }
  0xe1   : > { %4419 = vst [vmem:[#allocation78_spill] sm:$0xff] %v3002_v35  ;;  %v3007_v29 = vmul.f32 0.33333334, %v681_v28  ;;  %v3009_v0 = vmul.f32 0.33333334, %v682_v46  ;;  %1712 = vpow2.f32 %v806_v2  ;;  %v3024_v27 = vpop.eup %1688  ;;  %v847_v18 = vmul.f32 -0.5, %v3019_v25 }
  0xe2   : > { %4420 = vst [vmem:[#allocation79_spill] sm:$0xff] %v3004_v12  ;;  %v810_v15 = vmul.f32 1.442695, %v2962_v60  ;;  %v3012_v4 = vmul.f32 0.33333334, %v683_v8  ;;  %1714 = vpow2.f32 %v808_v30  ;;  %v3029_v41 = vpop.eup %1690  ;;  %v844_v31 = vadd.f32 1.0, %v3019_v25 }
  0xe3   : > { %4421 = vst [vmem:[#allocation80_spill] sm:$0xff] %v3007_v29  ;;  %4422 = vst [vmem:[#allocation81_spill] sm:$0xff] %v3009_v0  ;;  %v812_v40 = vmul.f32 1.442695, %v2965_v5  ;;  %v814_v63 = vmul.f32 1.442695, %v2969_v55  ;;  %v3034_v44 = vpop.eup %1692 }
  0xe4   : > { %4423 = vst [vmem:[#allocation82_spill] sm:$0xff] %v3012_v4  ;;  %v816_v28 = vmul.f32 1.442695, %v2972_v17  ;;  %v818_v46 = vmul.f32 1.442695, %v2976_v53  ;;  %1716 = vpow2.f32 %v810_v15  ;;  %v3041_v43 = vpop.eup %1694  ;;  %v853_v7 = vadd.f32 1.0, %v3024_v27 }
  0xe5   : > { %v820_v51 = vmul.f32 1.442695, %v2979_v22  ;;  %v822_v8 = vmul.f32 1.442695, %v2983_v62  ;;  %v824_v1 = vmul.f32 1.442695, %v2986_v20  ;;  %1718 = vpow2.f32 %v812_v40  ;;  %v3053_v39 = vpop.eup %1696 }
  0xe6   : > { %v826_v57 = vmul.f32 1.442695, %v2990_v3  ;;  %v828_v2 = vmul.f32 1.442695, %v2993_v52  ;;  %v830_v34 = vmul.f32 1.442695, %v2997_v24  ;;  %1720 = vpow2.f32 %v814_v63  ;;  %v3058_v37 = vpop.eup %1698 }
  0xe7   : > { %v832_v33 = vmul.f32 1.442695, %v2999_v10  ;;  %v834_v30 = vmul.f32 1.442695, %v3002_v35  ;;  %v836_v58 = vmul.f32 1.442695, %v3004_v12  ;;  %1722 = vpow2.f32 %v816_v28  ;;  %v3063_v45 = vpop.eup %1700 }
  0xe8   : > { %v3039_v13 = vmul.f32 1.442695, %v3007_v29  ;;  %v3044_v15 = vmul.f32 1.442695, %v3009_v0  ;;  %v3047_v47 = vmul.f32 1.442695, %v3012_v4  ;;  %1724 = vpow2.f32 %v818_v46  ;;  %v3071_v26 = vpop.eup %1702 }
  0xe9   : > { %1726 = vpow2.f32 %v820_v51  ;;  %v3066_v40 = vld [vmem:[%s2234_s29 + $0x10] sm:$0xff]  ;;  %v856_v46 = vmul.f32 -0.5, %v3024_v27  ;;  %v3076_v19 = vpop.eup %1704  ;;  %v848_v63 = vadd.f32 1.0, %v847_v18  ;;  %v874_v18 = vmul.f32 -0.5, %v3034_v44 }
  0xea   : > { %4426 = vst [vmem:[#allocation85_spill] sm:$0xff] %v3066_v40  ;;  %1728 = vpow2.f32 %v822_v8  ;;  %v3081_v16 = vpop.eup %1706  ;;  %v865_v8 = vmul.f32 -0.5, %v3029_v41  ;;  %v883_v0 = vmul.f32 -0.5, %v3041_v43  ;;  %v871_v4 = vadd.f32 1.0, %v3034_v44 }
  0xeb   : > { %1730 = vpow2.f32 %v824_v1  ;;  %v3085_v32 = vpop.eup %1708  ;;  %v3102_v51 = vmul.f32 %v3019_v25, %v848_v63  ;;  %v901_v29 = vmul.f32 -0.5, %v3058_v37  ;;  %v875_v63 = vadd.f32 1.0, %v874_v18 }
  0xec   : > { %1732 = vpow2.f32 %v826_v57  ;;  %v3090_v28 = vpop.eup %1710  ;;  %v857_v57 = vadd.f32 1.0, %v856_v46  ;;  %v892_v46 = vmul.f32 -0.5, %v3053_v39  ;;  %v910_v10 = vmul.f32 -0.5, %v3063_v45 }
  0xed   : > { %1734 = vpow2.f32 %v828_v2  ;;  %v862_v2 = vadd.f32 1.0, %v3029_v41  ;;  %v902_v52 = vadd.f32 1.0, %v901_v29  ;;  %v3136_v20 = vmul.f32 %v3034_v44, %v875_v63 }
  0xee   : > { %1736 = vpow2.f32 %v830_v34  ;;  %v3094_v23 = vpop.eup %1712  ;;  %v866_v34 = vadd.f32 1.0, %v865_v8  ;;  %v893_v18 = vadd.f32 1.0, %v892_v46  ;;  %v911_v46 = vadd.f32 1.0, %v910_v10 }
  0xef   : > { %1738 = vpow2.f32 %v832_v33  ;;  %v3099_v1 = vpop.eup %1714  ;;  %v884_v33 = vadd.f32 1.0, %v883_v0  ;;  %v919_v0 = vmul.f32 -0.5, %v3071_v26  ;;  %v907_v63 = vadd.f32 1.0, %v3063_v45 }
  0xf0   : > { %1740 = vpow2.f32 %v834_v30  ;;  %v3114_v30 = vmul.f32 %v3024_v27, %v857_v57  ;;  %v937_v53 = vmul.f32 -0.5, %v3081_v16  ;;  %v943_v55 = vadd.f32 1.0, %v3085_v32 }
  0xf1   : > { %v3105_v40 = vpop.eup %1716  ;;  %1742 = vpow2.f32 %v836_v58  ;;  %v880_v58 = vadd.f32 1.0, %v3041_v43  ;;  %v920_v29 = vadd.f32 1.0, %v919_v0  ;;  %v946_v5 = vmul.f32 -0.5, %v3085_v32 }
  0xf2   : > { %v3110_v12 = vpop.eup %1718  ;;  %1744 = vpow2.f32 %v3039_v13  ;;  %v3126_v13 = vmul.f32 %v3029_v41, %v866_v34  ;;  %v898_v34 = vadd.f32 1.0, %v3058_v37  ;;  %v955_v9 = vmul.f32 -0.5, %v3090_v28 }
  0xf3   : > { %v3117_v35 = vpop.eup %1720  ;;  %1746 = vpow2.f32 %v3044_v15  ;;  %v889_v15 = vadd.f32 1.0, %v3053_v39  ;;  %v938_v14 = vadd.f32 1.0, %v937_v53  ;;  %v973_v61 = vmul.f32 -0.5, %v3099_v1 }
  0xf4   : > { %v3122_v24 = vpop.eup %1722  ;;  %1748 = vpow2.f32 %v3047_v47  ;;  %4427 = vst [vmem:[#allocation86_spill] sm:$0xff] %v3126_v13  ;;  %v934_v47 = vadd.f32 1.0, %v3081_v16  ;;  %v4440_v53 = vand.u32 2147483647, %v3029_v41  ;;  %v4445_v54 = vand.u32 2147483647, %v3034_v44 }
  0xf5   : > { %v3129_v8 = vpop.eup %1724  ;;  %1750 = vlog2.f32 %v844_v31  ;;  %v3143_v31 = vmul.f32 %v3041_v43, %v884_v33  ;;  %v916_v33 = vadd.f32 1.0, %v3071_v26  ;;  %v956_v41 = vadd.f32 1.0, %v955_v9 }
  0xf6   : > { %v3133_v3 = vpop.eup %1726  ;;  %1752 = vlog2.f32 %v853_v7  ;;  %v3149_v7 = vmul.f32 %v3053_v39, %v893_v18  ;;  %v928_v18 = vmul.f32 -0.5, %v3076_v19  ;;  %vm3207_vm2 = vcmp.lt.f32.partialorder %v4440_v53, 0.0004427343 }
  0xf7   : > { %v3140_v57 = vpop.eup %1728  ;;  %1754 = vlog2.f32 %v862_v2  ;;  %4428 = vst [vmem:[#allocation87_spill] sm:$0xff] %v3143_v31  ;;  %v3156_v2 = vmul.f32 %v3058_v37, %v902_v52  ;;  %v922_v52 = vand.u32 2147483647, %v3071_v26  ;;  %vm3217_vm3 = vcmp.lt.f32.partialorder %v4445_v54, 0.0004427343 }
  0xf8   : > { %v3146_v62 = vpop.eup %1730  ;;  %1756 = vlog2.f32 %v871_v4  ;;  %4429 = vst [vmem:[#allocation88_spill] sm:$0xff] %v3149_v7  ;;  %v925_v4 = vadd.f32 1.0, %v3076_v19  ;;  %v929_v49 = vadd.f32 1.0, %v928_v18  ;;  %v4441_v18 = vmov 0 }
  0xf9   : > { %v3153_v22 = vpop.eup %1732  ;;  %1758 = vlog2.f32 %v880_v58  ;;  %v3167_v58 = vmul.f32 %v3063_v45, %v911_v46  ;;  %v952_v46 = vadd.f32 1.0, %v3090_v28  ;;  %v4442_v18 = vsel %vm3207_vm2, 4294967295, %v4441_v18 }
  0xfa   : > { %v3159_v10 = vpop.eup %1734  ;;  %1760 = vlog2.f32 %v889_v15  ;;  %v931_v15 = vand.u32 2147483647, %v3076_v19  ;;  %4443 = vst [vmem:[#allocation93_spill] sm:$0xff] %v4442_v18  ;;  %v4447_v42 = vsel %vm3217_vm3, 4294967295, %v4446_v42  ;;  %v982_v53 = vmul.f32 -0.5, %v3105_v40 }
  0xfb   : > { %v3164_v17 = vpop.eup %1736  ;;  %1762 = vlog2.f32 %v898_v34  ;;  %v3179_v34 = vmul.f32 %v3071_v26, %v920_v29  ;;  %v4436_v26 = vand.u32 2147483647, %v3024_v27  ;;  %v940_v27 = vand.u32 2147483647, %v3081_v16 }
  0xfc   : > { %v3171_v0 = vpop.eup %1738  ;;  %1764 = vlog2.f32 %v907_v63  ;;  %v4431_v63 = vand.u32 2147483647, %v3019_v25  ;;  %v964_v25 = vmul.f32 -0.5, %v3094_v23  ;;  %v949_v44 = vand.u32 2147483647, %v3085_v32 }
  0xfd   : > { %v3176_v60 = vpop.eup %1740  ;;  %1766 = vlog2.f32 %v916_v33  ;;  %v961_v33 = vadd.f32 1.0, %v3094_v23  ;;  %vm3196_vm1 = vcmp.lt.f32.partialorder %v4436_v26, 0.0004427343  ;;  %v947_v26 = vadd.f32 1.0, %v946_v5 }
  0xfe   : > { %v3183_v59 = vpop.eup %1742  ;;  %vm3187_vm0 = vcmp.lt.f32.partialorder %v4431_v63, 0.0004427343  ;;  %1768 = vlog2.f32 %v925_v4  ;;  %v970_v63 = vadd.f32 1.0, %v3099_v1  ;;  %v4449_v5 = vmov 0 }
  0xff   : > { %4430 = vst [vmem:[#allocation89_spill] sm:$0xff] %v3183_v59  ;;  %v4433_v56 = vsel %vm3187_vm0, 4294967295, %v4432_v56  ;;  %v3192_v38 = vpop.eup %1744  ;;  %1770 = vlog2.f32 %v934_v47  ;;  %v979_v47 = vadd.f32 1.0, %v3105_v40  ;;  %v991_v54 = vmul.f32 -0.5, %v3110_v12 }
 0x100   : > { %4434 = vst [vmem:[#allocation90_spill] sm:$0xff] %v4433_v56  ;;  %4435 = vst [vmem:[#allocation91_spill] sm:$0xff] %v3192_v38  ;;  %v3203_v4 = vpop.eup %1746  ;;  %1772 = vlog2.f32 %v943_v55  ;;  %v4448_v55 = vand.u32 2147483647, %v3041_v43  ;;  %v965_v21 = vadd.f32 1.0, %v964_v25  ;;  %v974_v59 = vadd.f32 1.0, %v973_v61 }
 0x101   : > { %4439 = vst [vmem:[#allocation92_spill] sm:$0xff] %v3203_v4  ;;  %v3213_v38 = vpop.eup %1748  ;;  %1774 = vlog2.f32 %v952_v46  ;;  %v988_v4 = vadd.f32 1.0, %v3110_v12  ;;  %v3235_v46 = vmul.f32 %v3081_v16, %v938_v14  ;;  %v958_v14 = vand.u32 2147483647, %v3090_v28 }
 0x102   : > { %4444 = vst [vmem:[#allocation94_spill] sm:$0xff] %v3213_v38  ;;  %v1751_v48 = vpop.eup %1750  ;;  %vm3225_vm4 = vcmp.lt.f32.partialorder %v4448_v55, 0.0004427343  ;;  %v3230_v38 = vmul.f32 %v3076_v19, %v929_v49  ;;  %1776 = vlog2.f32 %v961_v33  ;;  %v4453_v55 = vand.u32 2147483647, %v3053_v39 }
 0x103   : > { %v4450_v5 = vsel %vm3225_vm4, 4294967295, %v4449_v5  ;;  %v1753_v9 = vpop.eup %1752  ;;  %4452 = vst [vmem:[#allocation96_spill] sm:$0xff] %v3235_v46  ;;  %1778 = vlog2.f32 %v970_v63  ;;  %v4456_v19 = vand.u32 2147483647, %v3058_v37  ;;  %v4457_v49 = vmov 0 }
 0x104   : > { %4451 = vst [vmem:[#allocation95_spill] sm:$0xff] %v4450_v5  ;;  %v1755_v43 = vpop.eup %1754  ;;  %vm3239_vm5 = vcmp.lt.f32.partialorder %v4453_v55, 0.0004427343  ;;  %v3250_v33 = vmul.f32 %v3085_v32, %v947_v26  ;;  %v967_v61 = vand.u32 2147483647, %v3094_v23  ;;  %1780 = vlog2.f32 %v979_v47 }
 0x105   : > { %vm3245_vm6 = vcmp.lt.f32.partialorder %v4456_v19, 0.0004427343  ;;  %v1757_v16 = vpop.eup %1756  ;;  %v3254_v39 = vmul.f32 0.6931472, %v1751_v48  ;;  %v3257_v25 = vmul.f32 %v3090_v28, %v956_v41  ;;  %v983_v63 = vadd.f32 1.0, %v982_v53 }
 0x106   : > { %v4458_v49 = vsel %vm3245_vm6, 4294967295, %v4457_v49  ;;  %4459 = vst [vmem:[#allocation97_spill] sm:$0xff] %v3250_v33  ;;  %1782 = vlog2.f32 %v988_v4  ;;  %v1759_v37 = vpop.eup %1758  ;;  %v3259_v55 = vmul.f32 0.6931472, %v1753_v9  ;;  %v4462_v19 = vand.u32 2147483647, %v3063_v45 }
 0x107   : > { %4460 = vst [vmem:[#allocation98_spill] sm:$0xff] %v3254_v39  ;;  %4461 = vst [vmem:[#allocation99_spill] sm:$0xff] %v3257_v25  ;;  %v4463_v32 = vmov 0  ;;  %vm3267_vm8 = vcmp.lt.f32.partialorder %v922_v52, 0.0004427343  ;;  %v4465_v26 = vmov 0  ;;  %v1761_v41 = vpop.eup %1760  ;;  %v3284_v52 = vmul.f32 %v3094_v23, %v965_v21 }
 0x108   : > { %vm3263_vm7 = vcmp.lt.f32.partialorder %v4462_v19, 0.0004427343  ;;  %v4466_v26 = vsel %vm3267_vm8, 4294967295, %v4465_v26  ;;  %vm3271_vm9 = vcmp.lt.f32.partialorder %v931_v15, 0.0004427343  ;;  %v4467_v48 = vmov 0  ;;  %v1763_v19 = vpop.eup %1762 }
 0x109   : > { %v4464_v32 = vsel %vm3263_vm7, 4294967295, %v4463_v32  ;;  %v4468_v48 = vsel %vm3271_vm9, 4294967295, %v4467_v48  ;;  %v976_v28 = vand.u32 2147483647, %v3099_v1  ;;  %v992_v4 = vadd.f32 1.0, %v991_v54  ;;  %4473 = vst [vmem:[#allocation102_spill] sm:$0xff] %v3284_v52 }
 0x10a   : > { %v997_v47 = vadd.f32 1.0, %v3117_v35  ;;  %v3277_v53 = vmul.f32 0.6931472, %v1755_v43  ;;  %vm3279_vm10 = vcmp.lt.f32.partialorder %v940_v27, 0.0004427343  ;;  %v4470_v45 = vmov 0 }
 0x10b   : > { %v4471_v45 = vsel %vm3279_vm10, 4294967295, %v4470_v45  ;;  %v3287_v15 = vmul.f32 %v3099_v1, %v974_v59  ;;  %v985_v9 = vand.u32 2147483647, %v3105_v40  ;;  %v3290_v6 = vmul.f32 0.6931472, %v1757_v16  ;;  %v1765_v59 = vpop.eup %1764 }
 0x10c   : > { %4469 = vst [vmem:[#allocation100_spill] sm:$0xff] %v3277_v53  ;;  %4472 = vst [vmem:[#allocation101_spill] sm:$0xff] %v4471_v45  ;;  %vm3292_vm11 = vcmp.lt.f32.partialorder %v949_v44, 0.0004427343  ;;  %v4476_v54 = vmov 0  ;;  %v4479_v27 = vmov 0  ;;  %1784 = vlog2.f32 %v997_v47  ;;  %v1767_v16 = vpop.eup %1766 }
 0x10d   : > { %4474 = vst [vmem:[#allocation103_spill] sm:$0xff] %v3287_v15  ;;  %4475 = vst [vmem:[#allocation104_spill] sm:$0xff] %v3290_v6  ;;  %v4477_v54 = vsel %vm3292_vm11, 4294967295, %v4476_v54  ;;  %vm3296_vm12 = vcmp.lt.f32.partialorder %v958_v14, 0.0004427343  ;;  %v1000_v23 = vmul.f32 -0.5, %v3117_v35  ;;  %v3309_v44 = vmul.f32 %v3105_v40, %v983_v63  ;;  %v1769_v1 = vpop.eup %1768 }
 0x10e   : > { %4478 = vst [vmem:[#allocation105_spill] sm:$0xff] %v4477_v54  ;;  %v4480_v27 = vsel %vm3296_vm12, 4294967295, %v4479_v27  ;;  %v1006_v21 = vadd.f32 1.0, %v3122_v24  ;;  %v3306_v43 = vmul.f32 0.6931472, %v1759_v37  ;;  %v3317_v50 = vmul.f32 %v3110_v12, %v992_v4  ;;  %v1771_v4 = vpop.eup %1770 }
 0x10f   : > { %4481 = vst [vmem:[#allocation106_spill] sm:$0xff] %v4480_v27  ;;  %4483 = vst [vmem:[#allocation108_spill] sm:$0xff] %v3309_v44  ;;  %v994_v14 = vand.u32 2147483647, %v3110_v12  ;;  %v1009_v56 = vmul.f32 -0.5, %v3122_v24  ;;  %v4486_v39 = vmov 0  ;;  %v1773_v40 = vpop.eup %1772 }
 0x110   : > { %4482 = vst [vmem:[#allocation107_spill] sm:$0xff] %v3306_v43  ;;  %4484 = vst [vmem:[#allocation109_spill] sm:$0xff] %v3317_v50  ;;  %1786 = vlog2.f32 %v1006_v21  ;;  %v3324_v63 = vmul.f32 0.6931472, %v1761_v41  ;;  %v3326_v37 = vmul.f32 0.6931472, %v1763_v19  ;;  %v1775_v21 = vpop.eup %1774 }
 0x111   : > { %vm3328_vm13 = vcmp.lt.f32.partialorder %v967_v61, 0.0004427343  ;;  %v1003_v12 = vand.u32 2147483647, %v3117_v35  ;;  %v3337_v47 = vmul.f32 0.6931472, %v1765_v59 }
 0x112   : > { %4485 = vst [vmem:[#allocation110_spill] sm:$0xff] %v3324_v63  ;;  %v4487_v39 = vsel %vm3328_vm13, 4294967295, %v4486_v39  ;;  %v1001_v18 = vadd.f32 1.0, %v1000_v23  ;;  %v1015_v41 = vadd.f32 1.0, %v3129_v8  ;;  %v3344_v19 = vmul.f32 0.6931472, %v1767_v16 }
 0x113   : > { %4488 = vst [vmem:[#allocation111_spill] sm:$0xff] %v4487_v39  ;;  %v3346_v53 = vmul.f32 0.6931472, %v1769_v1  ;;  %vm3348_vm14 = vcmp.lt.f32.partialorder %v976_v28, 0.0004427343  ;;  %v4489_v13 = vmov 0  ;;  %v1777_v28 = vpop.eup %1776 }
 0x114   : > { %v4490_v13 = vsel %vm3348_vm14, 4294967295, %v4489_v13  ;;  %vm3352_vm15 = vcmp.lt.f32.partialorder %v985_v9, 0.0004427343  ;;  %v4492_v59 = vmov 0  ;;  %v1018_v23 = vmul.f32 -0.5, %v3129_v8  ;;  %v1779_v43 = vpop.eup %1778  ;;  %v4544_v44 = vld [vmem:[#allocation58_spill] sm:$0xff] }
 0x115   : > { %4491 = vst [vmem:[#allocation112_spill] sm:$0xff] %v4490_v13  ;;  %v4493_v59 = vsel %vm3352_vm15, 4294967295, %v4492_v59  ;;  %v3357_v6 = vmul.f32 0.6931472, %v1771_v4  ;;  %vm3359_vm3 = vcmp.lt.f32.partialorder %v994_v14, 0.0004427343  ;;  %1788 = vlog2.f32 %v1015_v41  ;;  %v1781_v7 = vpop.eup %1780 }
 0x116   : > { %4494 = vst [vmem:[#allocation113_spill] sm:$0xff] %v4493_v59  ;;  %v4496_v5 = vmov 0  ;;  %v1010_v16 = vadd.f32 1.0, %v1009_v56  ;;  %v1012_v1 = vand.u32 2147483647, %v3122_v24  ;;  %v3377_v56 = vmul.f32 %v3117_v35, %v1001_v18  ;;  %v4551_v27 = vld [vmem:[#allocation91_spill] sm:$0xff] }
 0x117   : > { %4495 = vst [vmem:[#allocation114_spill] sm:$0xff] %v3357_v6  ;;  %v4497_v5 = vsel %vm3359_vm3, 4294967295, %v4496_v5  ;;  %v3372_v61 = vmul.f32 0.6931472, %v1773_v40  ;;  %v3374_v14 = vmul.f32 0.6931472, %v1775_v21  ;;  %v1783_v21 = vpop.eup %1782 }
 0x118   : > { %4498 = vst [vmem:[#allocation115_spill] sm:$0xff] %v4497_v5  ;;  %4501 = vst [vmem:[#allocation118_spill] sm:$0xff] %v3377_v56  ;;  %vm3379_vm4 = vcmp.lt.f32.partialorder %v1003_v12, 0.0004427343  ;;  %v4502_v41 = vmov 0  ;;  %v1019_v31 = vadd.f32 1.0, %v1018_v23  ;;  %v3405_v40 = vmul.f32 %v3122_v24, %v1010_v16 }
 0x119   : > { %4499 = vst [vmem:[#allocation116_spill] sm:$0xff] %v3372_v61  ;;  %4500 = vst [vmem:[#allocation117_spill] sm:$0xff] %v3374_v14  ;;  %v4503_v41 = vsel %vm3379_vm4, 4294967295, %v4502_v41  ;;  %v1024_v9 = vadd.f32 1.0, %v3133_v3  ;;  %v1027_v63 = vmul.f32 -0.5, %v3133_v3  ;;  %v4507_v35 = vmov 0  ;;  %v1785_v46 = vpop.eup %1784 }
 0x11a   : > { %4504 = vst [vmem:[#allocation119_spill] sm:$0xff] %v4503_v41  ;;  %v1021_v12 = vand.u32 2147483647, %v3129_v8  ;;  %v3402_v4 = vmul.f32 0.6931472, %v1777_v28  ;;  %4506 = vst [vmem:[#allocation121_spill] sm:$0xff] %v3405_v40 }
 0x11b   : > { %vm3407_vm7 = vcmp.lt.f32.partialorder %v1012_v1, 0.0004427343  ;;  %1790 = vlog2.f32 %v1024_v9  ;;  %v3419_v28 = vmul.f32 0.6931472, %v1779_v43  ;;  %v1033_v24 = vadd.f32 1.0, %v3140_v57  ;;  %v4595_v29 = vld [vmem:[#allocation104_spill] sm:$0xff] }
 0x11c   : > { %4505 = vst [vmem:[#allocation120_spill] sm:$0xff] %v3402_v4  ;;  %v4508_v35 = vsel %vm3407_vm7, 4294967295, %v4507_v35  ;;  %v3422_v16 = vmul.f32 0.6931472, %v1781_v7  ;;  %v3425_v1 = vmul.f32 %v3129_v8, %v1019_v31  ;;  %v1028_v9 = vadd.f32 1.0, %v1027_v63 }
 0x11d   : > { %4509 = vst [vmem:[#allocation122_spill] sm:$0xff] %v4508_v35  ;;  %4510 = vst [vmem:[#allocation123_spill] sm:$0xff] %v3419_v28  ;;  %v1036_v6 = vmul.f32 -0.5, %v3140_v57  ;;  %v3428_v54 = vmul.f32 0.6931472, %v1783_v21  ;;  %v4514_v18 = vmov 0  ;;  %1792 = vlog2.f32 %v1033_v24  ;;  %v1787_v21 = vpop.eup %1786 }
 0x11e   : > { %4511 = vst [vmem:[#allocation124_spill] sm:$0xff] %v3422_v16  ;;  %4512 = vst [vmem:[#allocation125_spill] sm:$0xff] %v3425_v1  ;;  %vm3430_vm11 = vcmp.lt.f32.partialorder %v1021_v12, 0.0004427343  ;;  %v1042_v43 = vadd.f32 1.0, %v3146_v62  ;;  %v1045_v63 = vmul.f32 -0.5, %v3146_v62  ;;  %v3454_v7 = vmul.f32 %v3133_v3, %v1028_v9 }
 0x11f   : > { %4513 = vst [vmem:[#allocation126_spill] sm:$0xff] %v3428_v54  ;;  %v4515_v18 = vsel %vm3430_vm11, 4294967295, %v4514_v18  ;;  %v3439_v8 = vmul.f32 0.6931472, %v1785_v46  ;;  %v1030_v31 = vand.u32 2147483647, %v3133_v3 }
 0x120   : > { %4516 = vst [vmem:[#allocation127_spill] sm:$0xff] %v4515_v18  ;;  %v1037_v23 = vadd.f32 1.0, %v1036_v6  ;;  %1794 = vlog2.f32 %v1042_v43  ;;  %v1051_v12 = vadd.f32 1.0, %v3153_v22  ;;  %v1054_v24 = vmul.f32 -0.5, %v3153_v22  ;;  %4518 = vst [vmem:[#allocation129_spill] sm:$0xff] %v3454_v7  ;;  %v4541_v18 = vld [vmem:[#allocation30_spill] sm:$0xff] }
 0x121   : > { %4517 = vst [vmem:[#allocation128_spill] sm:$0xff] %v3439_v8  ;;  %v1039_v6 = vand.u32 2147483647, %v3140_v57  ;;  %v3461_v4 = vmul.f32 0.6931472, %v1787_v21  ;;  %v1046_v14 = vadd.f32 1.0, %v1045_v63 }
 0x122   : > { %v1048_v13 = vand.u32 2147483647, %v3146_v62  ;;  %1796 = vlog2.f32 %v1051_v12  ;;  %v1055_v28 = vadd.f32 1.0, %v1054_v24  ;;  %v1060_v59 = vadd.f32 1.0, %v3159_v10  ;;  %v1789_v3 = vpop.eup %1788  ;;  %v4542_v16 = vld [vmem:[#allocation31_spill] sm:$0xff] }
 0x123   : > { %4519 = vst [vmem:[#allocation130_spill] sm:$0xff] %v3461_v4  ;;  %v1063_v46 = vmul.f32 -0.5, %v3159_v10  ;;  %vm3470_vm15 = vcmp.lt.f32.partialorder %v1030_v31, 0.0004427343  ;;  %v4520_v5 = vmov 0  ;;  %v3475_v21 = vmul.f32 %v3140_v57, %v1037_v23 }
 0x124   : > { %v4521_v5 = vsel %vm3470_vm15, 4294967295, %v4520_v5  ;;  %v1069_v63 = vadd.f32 1.0, %v3164_v17  ;;  %v3478_v12 = vmul.f32 0.6931472, %v1789_v3  ;;  %vm3480_vm3 = vcmp.lt.f32.partialorder %v1039_v6, 0.0004427343 }
 0x125   : > { %4522 = vst [vmem:[#allocation131_spill] sm:$0xff] %v4521_v5  ;;  %4523 = vst [vmem:[#allocation132_spill] sm:$0xff] %v3475_v21  ;;  %v4525_v24 = vmov 0  ;;  %v1057_v43 = vand.u32 2147483647, %v3153_v22  ;;  %1798 = vlog2.f32 %v1060_v59  ;;  %v1072_v9 = vmul.f32 -0.5, %v3164_v17 }
 0x126   : > { %4524 = vst [vmem:[#allocation133_spill] sm:$0xff] %v3478_v12  ;;  %v4526_v24 = vsel %vm3480_vm3, 4294967295, %v4525_v24  ;;  %vm3490_vm4 = vcmp.lt.f32.partialorder %v1048_v13, 0.0004427343  ;;  %v4528_v57 = vmov 0  ;;  %1800 = vlog2.f32 %v1069_v63  ;;  %v4536_v63 = vld [vmem:[#allocation28_spill] sm:$0xff] }
 0x127   : > { %4527 = vst [vmem:[#allocation134_spill] sm:$0xff] %v4526_v24  ;;  %v4529_v57 = vsel %vm3490_vm4, 4294967295, %v4528_v57  ;;  %v1066_v23 = vand.u32 2147483647, %v3159_v10  ;;  %v1078_v6 = vadd.f32 1.0, %v3171_v0  ;;  %v3497_v3 = vmul.f32 %v3146_v62, %v1046_v14  ;;  %v4540_v62 = vld [vmem:[#allocation89_spill] sm:$0xff] }
 0x128   : > { %4530 = vst [vmem:[#allocation135_spill] sm:$0xff] %v4529_v57  ;;  %v3500_v59 = vmul.f32 %v3153_v22, %v1055_v28  ;;  %v1064_v8 = vadd.f32 1.0, %v1063_v46  ;;  %v1081_v56 = vmul.f32 -0.5, %v3171_v0  ;;  %v1791_v35 = vpop.eup %1790  ;;  %v1073_v31 = vadd.f32 1.0, %v1072_v9  ;;  %v4534_v46 = vld [vmem:[#allocation26_spill] sm:$0xff]  ;;  %v4535_v9 = vld [vmem:[#allocation53_spill] sm:$0xff] }
 0x129   : > { %4531 = vst [vmem:[#allocation136_spill] sm:$0xff] %v3497_v3  ;;  %v1075_v13 = vand.u32 2147483647, %v3164_v17  ;;  %1802 = vlog2.f32 %v1078_v6  ;;  %v1087_v4 = vadd.f32 1.0, %v3176_v60  ;;  %vm3510_vm14 = vcmp.lt.f32.partialorder %v1057_v43, 0.0004427343 }
 0x12a   : > { %v1084_v14 = vand.u32 2147483647, %v3171_v0  ;;  %v1090_v28 = vmul.f32 -0.5, %v3176_v60  ;;  %v3519_v6 = vmul.f32 0.6931472, %v1791_v35  ;;  %v1082_v43 = vadd.f32 1.0, %v1081_v56  ;;  %v1793_v1 = vpop.eup %1792 }
 0x12b   : > { %vm3521_vm7 = vcmp.lt.f32.partialorder %v1066_v23, 0.0004427343  ;;  %1804 = vlog2.f32 %v1087_v4  ;;  %v1096_v12 = vadd.f32 1.0, %v4540_v62  ;;  %v3528_v41 = vmul.f32 %v3159_v10, %v1064_v8  ;;  %v4543_v23 = vld [vmem:[#allocation59_spill] sm:$0xff]  ;;  %v4545_v4 = vld [vmem:[#allocation33_spill] sm:$0xff] }
 0x12c   : > { %4537 = vst [vmem:[#allocation26_spill] sm:$0xff] %v3519_v6  ;;  %v1091_v54 = vadd.f32 1.0, %v1090_v28  ;;  %v1093_v50 = vand.u32 2147483647, %v3176_v60  ;;  %v1099_v35 = vmul.f32 -0.5, %v4540_v62  ;;  %v3539_v15 = vmul.f32 %v3164_v17, %v1073_v31  ;;  %v4549_v28 = vld [vmem:[#allocation60_spill] sm:$0xff] }
 0x12d   : > { %v3536_v56 = vmul.f32 0.6931472, %v1793_v1  ;;  %vm3541_vm11 = vcmp.lt.f32.partialorder %v1075_v13, 0.0004427343  ;;  %1806 = vlog2.f32 %v1096_v12  ;;  %v1795_v8 = vpop.eup %1794  ;;  %v1102_v25 = vand.u32 2147483647, %v4540_v62 }
 0x12e   : > { %v1100_v39 = vadd.f32 1.0, %v1099_v35  ;;  %v1105_v61 = vadd.f32 1.0, %v4551_v27  ;;  %v1108_v1 = vmul.f32 -0.5, %v4551_v27  ;;  %v3558_v35 = vmul.f32 0.6931472, %v1795_v8  ;;  %v4559_v17 = vld [vmem:[#allocation66_spill] sm:$0xff] }
 0x12f   : > { %4546 = vst [vmem:[#allocation53_spill] sm:$0xff] %v3536_v56  ;;  %v3561_v52 = vmul.f32 %v3171_v0, %v1082_v43  ;;  %vm3563_vm10 = vcmp.lt.f32.partialorder %v1084_v14, 0.0004427343  ;;  %v1797_v33 = vpop.eup %1796  ;;  %v4560_v31 = vld [vmem:[#allocation67_spill] sm:$0xff]  ;;  %v3570_v13 = vmul.f32 %v3176_v60, %v1091_v54  ;;  %vm3572_vm6 = vcmp.lt.f32.partialorder %v1093_v50, 0.0004427343 }
 0x130   : > { %4556 = vst [vmem:[#allocation28_spill] sm:$0xff] %v3558_v35  ;;  %1808 = vlog2.f32 %v1105_v61  ;;  %v1109_v8 = vadd.f32 1.0, %v1108_v1  ;;  %v4563_v0 = vld [vmem:[#allocation92_spill] sm:$0xff]  ;;  %v4566_v6 = vld [vmem:[#allocation70_spill] sm:$0xff]  ;;  %v3585_v60 = vmul.f32 0.6931472, %v1797_v33  ;;  %v3597_v24 = vmul.f32 %v4540_v62, %v1100_v39 }
 0x131   : > { %v1114_v43 = vadd.f32 1.0, %v4563_v0  ;;  %v1111_v54 = vand.u32 2147483647, %v4551_v27  ;;  %v1117_v61 = vmul.f32 -0.5, %v4563_v0  ;;  %vm3599_vm13 = vcmp.lt.f32.partialorder %v1102_v25, 0.0004427343 }
 0x132   : > { %v4573_v50 = vld [vmem:[#allocation94_spill] sm:$0xff]  ;;  %v1799_v1 = vpop.eup %1798  ;;  %v4574_v21 = vld [vmem:[#allocation75_spill] sm:$0xff]  ;;  %v4575_v14 = vld [vmem:[#allocation76_spill] sm:$0xff]  ;;  %v3608_v57 = vmul.f32 %v4551_v27, %v1109_v8  ;;  %v1120_v39 = vand.u32 2147483647, %v4563_v0 }
 0x133   : > { %1810 = vlog2.f32 %v1114_v43  ;;  %v1123_v56 = vadd.f32 1.0, %v4573_v50  ;;  %vm772_vm9 = vcmp.gt.f32.partialorder %v4574_v21, 20.0  ;;  %vm773_vm8 = vcmp.gt.f32.partialorder %v4575_v14, 20.0  ;;  %v1801_v62 = vpop.eup %1800  ;;  %v4578_v35 = vld [vmem:[#allocation78_spill] sm:$0xff]  ;;  %v4643_v12 = vld [vmem:[#allocation117_spill] sm:$0xff] }
 0x134   : > { %4577 = vst [vmem:[#allocation89_spill] sm:$0xff] %v3608_v57  ;;  %v1118_v7 = vadd.f32 1.0, %v1117_v61  ;;  %v1126_v25 = vmul.f32 -0.5, %v4573_v50  ;;  %vm775_vm15 = vcmp.gt.f32.partialorder %v4578_v35, 20.0  ;;  %v1059_v14 = vsel %vm3510_vm14, %v3500_v59, %v3585_v60  ;;  %v4583_v43 = vld [vmem:[#allocation98_spill] sm:$0xff] }
 0x135   : > { %v1062_v21 = vmul.f32 0.6931472, %v1799_v1  ;;  %1812 = vlog2.f32 %v1123_v56  ;;  %v1129_v27 = vand.u32 2147483647, %v4573_v50  ;;  %v1071_v8 = vmul.f32 0.6931472, %v1801_v62 }
 0x136   : > { %vm3619_vm12 = vcmp.lt.f32.partialorder %v1111_v54, 0.0004427343  ;;  %v3624_v57 = vmul.f32 %v4563_v0, %v1118_v7  ;;  %v1127_v35 = vadd.f32 1.0, %v1126_v25  ;;  %v4584_v3 = vsel %vm3187_vm0, %v3102_v51, %v4583_v43  ;;  %v1803_v22 = vpop.eup %1802  ;;  %v4586_v56 = vld [vmem:[#allocation80_spill] sm:$0xff]  ;;  %v4603_v54 = vld [vmem:[#allocation107_spill] sm:$0xff]  ;;  %v4608_v25 = vld [vmem:[#allocation110_spill] sm:$0xff] }
 0x137   : > { %vm4585_vm14 = vcmp.gt.f32.partialorder %v2883_v11, 20.0  ;;  %vm777_vm4 = vcmp.gt.f32.partialorder %v4586_v56, 20.0  ;;  %v1068_v60 = vsel %vm3521_vm7, %v3528_v41, %v1062_v21  ;;  %v4587_v7 = vsel %vm3196_vm1, %v3114_v30, %v3259_v55  ;;  %v4713_v33 = vld [vmem:[#allocation74_spill] sm:$0xff] }
 0x138   : > { %v3634_v59 = vsel %vm4585_vm14, %v2883_v11, %v4584_v3  ;;  %vm4588_vm0 = vcmp.gt.f32.partialorder %v4534_v46, 20.0  ;;  %v4590_v11 = vld [vmem:[#allocation86_spill] sm:$0xff]  ;;  %v4591_v3 = vld [vmem:[#allocation100_spill] sm:$0xff]  ;;  %vm4593_vm14 = vcmp.gt.f32.partialorder %v4535_v9, 20.0  ;;  %vm4594_vm7 = vnez %v4447_v42  ;;  %v4600_v42 = vld [vmem:[#allocation95_spill] sm:$0xff]  ;;  %v1805_v10 = vpop.eup %1804 }
 0x139   : > { %v3648_v51 = vsel %vm4588_vm0, %v4534_v46, %v4587_v7  ;;  %v4592_v0 = vsel %vm3207_vm2, %v4590_v11, %v4591_v3  ;;  %v4596_v30 = vsel %vm4594_vm7, %v3136_v20, %v4595_v29  ;;  %vm4597_vm1 = vcmp.gt.f32.partialorder %v4536_v63, 20.0  ;;  %v4602_v20 = vld [vmem:[#allocation87_spill] sm:$0xff] }
 0x13a   : > { %v3658_v40 = vsel %vm4593_vm14, %v4535_v9, %v4592_v0  ;;  %v3668_v55 = vsel %vm4597_vm1, %v4536_v63, %v4596_v30  ;;  %v1077_v41 = vsel %vm3541_vm11, %v3539_v15, %v1071_v8  ;;  %v1080_v21 = vmul.f32 0.6931472, %v1803_v22  ;;  %v4606_v15 = vld [vmem:[#allocation81_spill] sm:$0xff]  ;;  %v4638_v8 = vld [vmem:[#allocation62_spill] sm:$0xff]  ;;  %v4642_v7 = vld [vmem:[#allocation99_spill] sm:$0xff] }
 0x13b   : > { %vm3673_vm2 = vcmp.lt.f32.partialorder %v1120_v39, 0.0004427343  ;;  %v3678_v9 = vmul.f32 %v4573_v50, %v1127_v35  ;;  %vm4601_vm0 = vnez %v4600_v42  ;;  %vm4605_vm14 = vcmp.gt.f32.partialorder %v4541_v18, 20.0  ;;  %v4607_v39 = vld [vmem:[#allocation88_spill] sm:$0xff]  ;;  %v4640_v22 = vld [vmem:[#allocation106_spill] sm:$0xff]  ;;  %v4645_v3 = vld [vmem:[#allocation63_spill] sm:$0xff] }
 0x13c   : > { %v4604_v1 = vsel %vm4601_vm0, %v4602_v20, %v4603_v54  ;;  %v4609_v62 = vsel %vm3239_vm5, %v4607_v39, %v4608_v25  ;;  %vm4610_vm7 = vcmp.gt.f32.partialorder %v4542_v16, 20.0  ;;  %vm4611_vm1 = vnez %v4458_v49  ;;  %v4647_v29 = vld [vmem:[#allocation111_spill] sm:$0xff]  ;;  %v4649_v30 = vld [vmem:[#allocation102_spill] sm:$0xff]  ;;  %v4652_v20 = vld [vmem:[#allocation64_spill] sm:$0xff] }
 0x13d   : > { %v3688_v63 = vsel %vm4605_vm14, %v4541_v18, %v4604_v1  ;;  %v1137_v35 = vsel %vm4610_vm7, %v4542_v16, %v4609_v62  ;;  %v4612_v50 = vsel %vm4611_vm1, %v3156_v2, %v3326_v37  ;;  %vm4613_vm0 = vcmp.gt.f32.partialorder %v4543_v23, 20.0  ;;  %v4654_v1 = vld [vmem:[#allocation112_spill] sm:$0xff]  ;;  %v4657_v39 = vld [vmem:[#allocation123_spill] sm:$0xff]  ;;  %v4659_v62 = vld [vmem:[#allocation65_spill] sm:$0xff] }
 0x13e   : > { %v1138_v18 = vsel %vm4613_vm0, %v4543_v23, %v4612_v50  ;;  %vm4614_vm14 = vnez %v4464_v32  ;;  %vm4616_vm5 = vcmp.gt.f32.partialorder %v4544_v44, 20.0  ;;  %vm4617_vm7 = vnez %v4466_v26  ;;  %v1807_v23 = vpop.eup %1806 }
 0x13f   : > { %v4615_v36 = vsel %vm4614_vm14, %v3167_v58, %v3337_v47  ;;  %v4618_v49 = vsel %vm4617_vm7, %v3179_v34, %v3344_v19  ;;  %vm4619_vm1 = vcmp.gt.f32.partialorder %v4545_v4, 20.0  ;;  %v1086_v32 = vsel %vm3563_vm10, %v3561_v52, %v1080_v21  ;;  %v4627_v47 = vld [vmem:[#allocation96_spill] sm:$0xff]  ;;  %v4628_v19 = vld [vmem:[#allocation114_spill] sm:$0xff]  ;;  %v4630_v52 = vld [vmem:[#allocation61_spill] sm:$0xff] }
 0x140   : > { %v1139_v43 = vsel %vm4616_vm5, %v4544_v44, %v4615_v36  ;;  %v1140_v2 = vsel %vm4619_vm1, %v4545_v4, %v4618_v49  ;;  %v1089_v37 = vmul.f32 0.6931472, %v1805_v10  ;;  %vm3726_vm0 = vcmp.lt.f32.partialorder %v1129_v27, 0.0004427343  ;;  %v4625_v44 = vld [vmem:[#allocation101_spill] sm:$0xff]  ;;  %v4632_v4 = vld [vmem:[#allocation82_spill] sm:$0xff] }
 0x141   : > { %vm4622_vm14 = vnez %v4468_v48  ;;  %vm4624_vm5 = vcmp.gt.f32.partialorder %v4549_v28, 20.0  ;;  %vm4626_vm7 = vnez %v4625_v44  ;;  %vm4631_vm10 = vcmp.gt.f32.partialorder %v4630_v52, 20.0  ;;  %v4633_v48 = vld [vmem:[#allocation105_spill] sm:$0xff]  ;;  %v4650_v21 = vld [vmem:[#allocation120_spill] sm:$0xff]  ;;  %v4656_v10 = vld [vmem:[#allocation103_spill] sm:$0xff] }
 0x142   : > { %v4623_v26 = vsel %vm4622_vm14, %v3230_v38, %v3346_v53  ;;  %v4629_v45 = vsel %vm4626_vm7, %v4627_v47, %v4628_v19  ;;  %vm779_vm1 = vcmp.gt.f32.partialorder %v4632_v4, 20.0  ;;  %vm4634_vm11 = vnez %v4633_v48  ;;  %v4635_v27 = vld [vmem:[#allocation97_spill] sm:$0xff]  ;;  %v4636_v38 = vld [vmem:[#allocation116_spill] sm:$0xff] }
 0x143   : > { %v1141_v34 = vsel %vm4624_vm5, %v4549_v28, %v4623_v26  ;;  %v1142_v16 = vsel %vm4631_vm10, %v4630_v52, %v4629_v45  ;;  %v4637_v53 = vsel %vm4634_vm11, %v4635_v27, %v4636_v38  ;;  %vm4639_vm14 = vcmp.gt.f32.partialorder %v4638_v8, 20.0  ;;  %v4661_v26 = vld [vmem:[#allocation113_spill] sm:$0xff]  ;;  %v4663_v44 = vld [vmem:[#allocation108_spill] sm:$0xff]  ;;  %v4667_v52 = vld [vmem:[#allocation115_spill] sm:$0xff] }
 0x144   : > { %v1143_v28 = vsel %vm4639_vm14, %v4638_v8, %v4637_v53  ;;  %vm4641_vm5 = vnez %v4640_v22  ;;  %vm4646_vm7 = vcmp.gt.f32.partialorder %v4645_v3, 20.0  ;;  %vm4648_vm10 = vnez %v4647_v29  ;;  %v4664_v47 = vld [vmem:[#allocation124_spill] sm:$0xff]  ;;  %v4669_v48 = vld [vmem:[#allocation109_spill] sm:$0xff]  ;;  %v4670_v27 = vld [vmem:[#allocation126_spill] sm:$0xff] }
 0x145   : > { %v4644_v11 = vsel %vm4641_vm5, %v4642_v7, %v4643_v12  ;;  %v4651_v42 = vsel %vm4648_vm10, %v4649_v30, %v4650_v21  ;;  %vm4653_vm11 = vcmp.gt.f32.partialorder %v4652_v20, 20.0  ;;  %vm4655_vm14 = vnez %v4654_v1  ;;  %v4678_v8 = vld [vmem:[#allocation68_spill] sm:$0xff]  ;;  %v4680_v7 = vld [vmem:[#allocation122_spill] sm:$0xff]  ;;  %v4687_v30 = vld [vmem:[#allocation127_spill] sm:$0xff] }
 0x146   : > { %v1144_v0 = vsel %vm4646_vm7, %v4645_v3, %v4644_v11  ;;  %v1145_v54 = vsel %vm4653_vm11, %v4652_v20, %v4651_v42  ;;  %v4658_v25 = vsel %vm4655_vm14, %v4656_v10, %v4657_v39  ;;  %vm4660_vm5 = vcmp.gt.f32.partialorder %v4659_v62, 20.0  ;;  %v4683_v12 = vld [vmem:[#allocation130_spill] sm:$0xff]  ;;  %v4685_v3 = vld [vmem:[#allocation69_spill] sm:$0xff]  ;;  %v4693_v1 = vld [vmem:[#allocation131_spill] sm:$0xff] }
 0x147   : > { %v1146_v50 = vsel %vm4660_vm5, %v4659_v62, %v4658_v25  ;;  %v1095_v36 = vsel %vm3572_vm6, %v3570_v13, %v1089_v37  ;;  %v1098_v49 = vmul.f32 0.6931472, %v1807_v23  ;;  %vm4662_vm7 = vnez %v4661_v26  ;;  %v4673_v13 = vld [vmem:[#allocation119_spill] sm:$0xff]  ;;  %v4675_v37 = vld [vmem:[#allocation118_spill] sm:$0xff]  ;;  %v4676_v23 = vld [vmem:[#allocation128_spill] sm:$0xff] }
 0x148   : > { %v4665_v19 = vsel %vm4662_vm7, %v4663_v44, %v4664_v47  ;;  %vm4666_vm10 = vcmp.gt.f32.partialorder %v4559_v17, 20.0  ;;  %vm4668_vm11 = vnez %v4667_v52  ;;  %vm4672_vm14 = vcmp.gt.f32.partialorder %v4560_v31, 20.0  ;;  %v4690_v21 = vld [vmem:[#allocation133_spill] sm:$0xff]  ;;  %v4696_v39 = vld [vmem:[#allocation26_spill] sm:$0xff]  ;;  %v4698_v62 = vld [vmem:[#allocation71_spill] sm:$0xff]  ;;  %v1809_v44 = vpop.eup %1808 }
 0x149   : > { %v1147_v45 = vsel %vm4666_vm10, %v4559_v17, %v4665_v19  ;;  %v4671_v38 = vsel %vm4668_vm11, %v4669_v48, %v4670_v27  ;;  %vm4674_vm6 = vnez %v4673_v13  ;;  %vm4679_vm5 = vcmp.gt.f32.partialorder %v4678_v8, 20.0  ;;  %v4682_v17 = vld [vmem:[#allocation121_spill] sm:$0xff]  ;;  %v4701_v52 = vld [vmem:[#allocation132_spill] sm:$0xff]  ;;  %v4706_v13 = vld [vmem:[#allocation135_spill] sm:$0xff] }
 0x14a   : > { %v1148_v5 = vsel %vm4672_vm14, %v4560_v31, %v4671_v38  ;;  %v4677_v53 = vsel %vm4674_vm6, %v4675_v37, %v4676_v23  ;;  %vm4681_vm7 = vnez %v4680_v7  ;;  %vm4686_vm10 = vcmp.gt.f32.partialorder %v4685_v3, 20.0  ;;  %v4689_v31 = vld [vmem:[#allocation125_spill] sm:$0xff]  ;;  %v4708_v37 = vld [vmem:[#allocation136_spill] sm:$0xff] }
 0x14b   : > { %v1149_v22 = vsel %vm4679_vm5, %v4678_v8, %v4677_v53  ;;  %v4684_v11 = vsel %vm4681_vm7, %v4682_v17, %v4683_v12  ;;  %vm4688_vm11 = vnez %v4687_v30  ;;  %vm4692_vm14 = vcmp.gt.f32.partialorder %v4566_v6, 20.0  ;;  %v4695_v10 = vld [vmem:[#allocation129_spill] sm:$0xff]  ;;  %v4709_v23 = vld [vmem:[#allocation28_spill] sm:$0xff]  ;;  %v4715_v17 = vld [vmem:[#allocation75_spill] sm:$0xff] }
 0x14c   : > { %v1150_v29 = vsel %vm4686_vm10, %v4685_v3, %v4684_v11  ;;  %v4691_v42 = vsel %vm4688_vm11, %v4689_v31, %v4690_v21  ;;  %vm4694_vm6 = vnez %v4693_v1  ;;  %vm4699_vm5 = vcmp.gt.f32.partialorder %v4698_v62, 20.0  ;;  %v4702_v48 = vld [vmem:[#allocation53_spill] sm:$0xff]  ;;  %v4716_v11 = vld [vmem:[#allocation76_spill] sm:$0xff]  ;;  %v1167_v21 = vld [vmem:[%s2234_s29 + $0x18] sm:$0xff] }
 0x14d   : > { %v1151_v20 = vsel %vm4692_vm14, %v4566_v6, %v4691_v42  ;;  %v4697_v25 = vsel %vm4694_vm6, %v4695_v10, %v4696_v39  ;;  %v1104_v47 = vsel %vm3599_vm13, %v3597_v24, %v1098_v49  ;;  %v4703_v27 = vsel %vm3480_vm3, %v4701_v52, %v4702_v48  ;;  %v4704_v6 = vld [vmem:[#allocation72_spill] sm:$0xff]  ;;  %v4711_v8 = vld [vmem:[#allocation73_spill] sm:$0xff]  ;;  %v1811_v42 = vpop.eup %1810  ;;  %v4719_v1 = vld [vmem:[#allocation78_spill] sm:$0xff] }
 0x14e   : > { %v1152_v26 = vsel %vm4699_vm5, %v4698_v62, %v4697_v25  ;;  %vm4705_vm7 = vcmp.gt.f32.partialorder %v4704_v6, 20.0  ;;  %vm4707_vm10 = vnez %v4706_v13  ;;  %vm4712_vm11 = vcmp.gt.f32.partialorder %v4711_v8, 20.0  ;;  %v4717_v30 = vld [vmem:[#allocation77_spill] sm:$0xff]  ;;  %v1813_v48 = vpop.eup %1812 }
 0x14f   : > { %v1153_v38 = vsel %vm4705_vm7, %v4704_v6, %v4703_v27  ;;  %v4710_v53 = vsel %vm4707_vm10, %v4708_v37, %v4709_v23  ;;  %vm4714_vm13 = vcmp.gt.f32.partialorder %v4713_v33, 20.0  ;;  %v1107_v49 = vmul.f32 0.6931472, %v1809_v44  ;;  %v4722_v25 = vld [vmem:[#allocation85_spill] sm:$0xff] }
 0x150   : > { %v1154_v7 = vsel %vm4712_vm11, %v4711_v8, %v4710_v53  ;;  %v1155_v24 = vsel %vm4714_vm13, %v4713_v33, %v1059_v14  ;;  %v1156_v12 = vsel %vm772_vm9, %v4715_v17, %v1068_v60  ;;  %v1157_v3 = vsel %vm773_vm8, %v4716_v11, %v1077_v41  ;;  %v4720_v14 = vld [vmem:[#allocation79_spill] sm:$0xff]  ;;  %v4723_v44 = vld [vmem:[#allocation89_spill] sm:$0xff] }
 0x151   : > { %vm4718_vm3 = vcmp.gt.f32.partialorder %v4717_v30, 20.0  ;;  %v1159_v10 = vsel %vm775_vm15, %v4719_v1, %v1095_v36  ;;  %vm4721_vm14 = vcmp.gt.f32.partialorder %v4720_v14, 20.0  ;;  %v1188_v60 = vrot.slane %v4722_v25, 3  ;;  %v4725_v17 = vld [vmem:[#allocation83_spill] sm:$0xff] }
 0x152   : > { %v1158_v31 = vsel %vm4718_vm3, %v4717_v30, %v1086_v32  ;;  %v1160_v39 = vsel %vm4721_vm14, %v4720_v14, %v1104_v47  ;;  %v1189_v62 = vrot.slane %v4722_v25, 4  ;;  %v1113_v41 = vsel %vm3619_vm12, %v4723_v44, %v1107_v49 }
 0x153   : > { %v1116_v19 = vmul.f32 0.6931472, %v1811_v42  ;;  %v1190_v32 = vrot.slane %v4722_v25, 5  ;;  %v1191_v52 = vrot.slane %v4722_v25, 6  ;;  %v1161_v36 = vsel %vm777_vm4, %v4586_v56, %v1113_v41 }
 0x154   : > { %v1192_v47 = vrot.slane %v4722_v25, 7  ;;  %v1193_v27 = vrot.slane %v1167_v21, 1  ;;  %v1194_v6 = vrot.slane %v1167_v21, 2  ;;  %v1125_v61 = vmul.f32 0.6931472, %v1813_v48  ;;  %v4733_v48 = vld [vmem:[#allocation84_spill] sm:$0xff] }
 0x155   : > { %v1122_v13 = vsel %vm3673_vm2, %v3624_v57, %v1116_v19  ;;  %v1195_v37 = vrot.slane %v1167_v21, 3  ;;  %v1196_v23 = vrot.slane %v1167_v21, 4  ;;  %vm4724_vm8 = vcmp.gt.f32.partialorder %v4606_v15, 20.0 }
 0x156   : > { %v1162_v53 = vsel %vm4724_vm8, %v4606_v15, %v1122_v13  ;;  %v1197_v8 = vrot.slane %v1167_v21, 5  ;;  %v1198_v33 = vrot.slane %v1167_v21, 6  ;;  %v1199_v49 = vrot.slane %v1167_v21, 7 }
 0x157   : > { %v1131_v56 = vsel %vm3726_vm0, %v3678_v9, %v1125_v61  ;;  %v1232_v11 = vmul.f32 %v4725_v17, %v3634_v59  ;;  %v4726_v57 = vrot.slane %v4725_v17, 1  ;;  %v4727_v30 = vrot.slane %v4725_v17, 2 }
 0x158   : > { %v1163_v15 = vsel %vm779_vm1, %v4632_v4, %v1131_v56  ;;  %v4728_v1 = vrot.slane %v4725_v17, 3  ;;  %v4729_v9 = vrot.slane %v4725_v17, 4  ;;  %v4730_v14 = vrot.slane %v4725_v17, 5 }
 0x159   : > { %v1233_v46 = vmul.f32 %v4726_v57, %v3648_v51  ;;  %v1234_v42 = vmul.f32 %v4727_v30, %v3658_v40  ;;  %v4731_v51 = vrot.slane %v4725_v17, 6  ;;  %v4732_v40 = vrot.slane %v4725_v17, 7 }
 0x15a   : > { %v1235_v58 = vmul.f32 %v4728_v1, %v3668_v55  ;;  %v1236_v59 = vmul.f32 %v4729_v9, %v3688_v63  ;;  %v1237_v44 = vmul.f32 %v4730_v14, %v1137_v35  ;;  %v1240_v13 = vmul.f32 %v4733_v48, %v1140_v2 }
 0x15b   : > { %v1238_v41 = vmul.f32 %v4731_v51, %v1138_v18  ;;  %v1239_v19 = vmul.f32 %v4732_v40, %v1139_v43  ;;  %v4734_v4 = vrot.slane %v4733_v48, 1  ;;  %v4735_v55 = vrot.slane %v4733_v48, 2 }
 0x15c   : > { %v4736_v57 = vrot.slane %v4733_v48, 3  ;;  %v4737_v30 = vrot.slane %v4733_v48, 4  ;;  %v4738_v1 = vrot.slane %v4733_v48, 5  ;;  %v4739_v17 = vrot.slane %v4733_v48, 6 }
 0x15d   : > { %v1241_v61 = vmul.f32 %v4734_v4, %v1141_v34  ;;  %v1242_v56 = vmul.f32 %v4735_v55, %v1142_v16  ;;  %v4740_v2 = vrot.slane %v4733_v48, 7  ;;  %v1248_v34 = vmul.f32 %v4722_v25, %v1148_v5  ;;  %v4743_v5 = vld [vmem:[#allocation34_spill] sm:$0xff] }
 0x15e   : > { %v1243_v63 = vmul.f32 %v4736_v57, %v1143_v28  ;;  %v1244_v35 = vmul.f32 %v4737_v30, %v1144_v0  ;;  %v1245_v18 = vmul.f32 %v4738_v1, %v1145_v54  ;;  %v1246_v43 = vmul.f32 %v4739_v17, %v1146_v50 }
 0x15f   : > { %v1247_v9 = vmul.f32 %v4740_v2, %v1147_v45  ;;  %v4741_v14 = vrot.slane %v4722_v25, 1  ;;  %v4742_v51 = vrot.slane %v4722_v25, 2  ;;  %v1251_v40 = vmul.f32 %v1188_v60, %v1151_v20  ;;  %v4746_v20 = vld [vmem:[#allocation37_spill] sm:$0xff] }
 0x160   : > { %v1252_v4 = vmul.f32 %v1189_v62, %v1152_v26  ;;  %v1253_v0 = vmul.f32 %v1190_v32, %v1153_v38  ;;  %v1254_v55 = vmul.f32 %v1191_v52, %v1154_v7  ;;  %v1255_v57 = vmul.f32 %v1192_v47, %v1155_v24  ;;  %v4747_v26 = vld [vmem:[#allocation38_spill] sm:$0xff]  ;;  %v4748_v7 = vld [vmem:[#allocation39_spill] sm:$0xff]  ;;  %v4753_v52 = vld [vmem:[#allocation44_spill] sm:$0xff] }
 0x161   : > { %v1249_v16 = vmul.f32 %v4741_v14, %v1149_v22  ;;  %v1250_v28 = vmul.f32 %v4742_v51, %v1150_v29  ;;  %v1256_v54 = vmul.f32 %v1167_v21, %v1156_v12  ;;  %v1257_v30 = vmul.f32 %v1193_v27, %v1157_v3  ;;  %v4744_v22 = vld [vmem:[#allocation35_spill] sm:$0xff]  ;;  %v4745_v29 = vld [vmem:[#allocation36_spill] sm:$0xff]  ;;  %v4754_v47 = vld [vmem:[#allocation45_spill] sm:$0xff] }
 0x162   : > { %v1258_v1 = vmul.f32 %v1194_v6, %v1158_v31  ;;  %v1259_v50 = vmul.f32 %v1195_v37, %v1159_v10  ;;  %v1260_v17 = vmul.f32 %v1196_v23, %v1160_v39  ;;  %v1261_v48 = vmul.f32 %v1197_v8, %v1161_v36  ;;  %v4749_v12 = vld [vmem:[#allocation40_spill] sm:$0xff]  ;;  %v4750_v31 = vld [vmem:[#allocation41_spill] sm:$0xff]  ;;  %v4751_v10 = vld [vmem:[#allocation42_spill] sm:$0xff] }
 0x163   : > { %v1262_v45 = vmul.f32 %v1198_v33, %v1162_v53  ;;  %v1263_v2 = vmul.f32 %v1199_v49, %v1163_v15  ;;  %v1264_v14 = vadd.f32 %v1232_v11, %v4743_v5  ;;  %v1265_v25 = vadd.f32 %v1233_v46, %v4744_v22  ;;  %v4752_v62 = vld [vmem:[#allocation43_spill] sm:$0xff]  ;;  %v4755_v6 = vld [vmem:[#allocation46_spill] sm:$0xff]  ;;  %v4757_v8 = vld [vmem:[#allocation48_spill] sm:$0xff] }
 0x164   : > { %v1266_v51 = vadd.f32 %v1234_v42, %v4745_v29  ;;  %v1267_v60 = vadd.f32 %v1235_v58, %v4746_v20  ;;  %v1268_v38 = vadd.f32 %v1236_v59, %v4747_v26  ;;  %v1269_v24 = vadd.f32 %v1237_v44, %v4748_v7  ;;  %v4756_v23 = vld [vmem:[#allocation47_spill] sm:$0xff]  ;;  %v4758_v49 = vld [vmem:[#allocation49_spill] sm:$0xff]  ;;  %v4759_v46 = vld [vmem:[#allocation50_spill] sm:$0xff] }
 0x165   : > { %v1270_v3 = vadd.f32 %v1238_v41, %v4749_v12  ;;  %v1271_v21 = vadd.f32 %v1239_v19, %v4750_v31  ;;  %v1272_v39 = vadd.f32 %v1240_v13, %v4751_v10  ;;  %v1273_v32 = vadd.f32 %v1241_v61, %v4752_v62  ;;  %v4760_v15 = vld [vmem:[#allocation20_spill] sm:$0xff]  ;;  %v4761_v59 = vld [vmem:[#allocation21_spill] sm:$0xff]  ;;  %v4762_v41 = vld [vmem:[#allocation51_spill] sm:$0xff] }
 0x166   : > { %v1274_v36 = vadd.f32 %v1242_v56, %v4753_v52  ;;  %v1275_v27 = vadd.f32 %v1243_v63, %v4754_v47  ;;  %v1276_v37 = vadd.f32 %v1244_v35, %v4755_v6  ;;  %v1277_v53 = vadd.f32 %v1245_v18, %v4756_v23  ;;  %v4763_v13 = vld [vmem:[#allocation22_spill] sm:$0xff]  ;;  %v4764_v56 = vld [vmem:[#allocation23_spill] sm:$0xff]  ;;  %v4765_v35 = vld [vmem:[#allocation52_spill] sm:$0xff] }
 0x167   : > { %v3946_v33 = vadd.f32 %v1246_v43, %v4757_v8  ;;  %v3949_v11 = vadd.f32 %v1247_v9, %v4758_v49  ;;  %v1280_v42 = vadd.f32 %v1248_v34, %v4759_v46  ;;  %v1281_v58 = vadd.f32 %v1249_v16, %v4760_v15  ;;  %v4766_v43 = vld [vmem:[#allocation24_spill] sm:$0xff]  ;;  %v4767_v5 = vld [vmem:[#allocation25_spill] sm:$0xff]  ;;  %v4768_v22 = vld [vmem:[#allocation54_spill] sm:$0xff] }
 0x168   : > { %v1282_v44 = vadd.f32 %v1250_v28, %v4761_v59  ;;  %v1283_v19 = vadd.f32 %v1251_v40, %v4762_v41  ;;  %v3956_v61 = vadd.f32 %v1252_v4, %v4763_v13  ;;  %v3959_v63 = vadd.f32 %v1253_v0, %v4764_v56  ;;  %v4769_v29 = vld [vmem:[#allocation27_spill] sm:$0xff]  ;;  %v4771_v4 = vld [vmem:[#allocation29_spill] sm:$0xff]  ;;  %v4772_v0 = vld [vmem:[#allocation56_spill] sm:$0xff] }
 0x169   : > { %v3962_v18 = vadd.f32 %v1254_v55, %v4765_v35  ;;  %v3965_v9 = vadd.f32 %v1255_v57, %v4766_v43  ;;  %v1288_v34 = vadd.f32 %v1256_v54, %v4767_v5  ;;  %v1289_v16 = vadd.f32 %v1257_v30, %v4768_v22  ;;  %v4770_v40 = vld [vmem:[#allocation55_spill] sm:$0xff]  ;;  %v4773_v55 = vld [vmem:[#allocation57_spill] sm:$0xff]  ;;  %v4774_v57 = vld [vmem:[#allocation32_spill] sm:$0xff] }
 0x16a   : > { %v3970_v28 = vadd.f32 %v1258_v1, %v4769_v29  ;;  %v3973_v20 = vadd.f32 %v1259_v50, %v4770_v40  ;;  %v3976_v26 = vadd.f32 %v1260_v17, %v4771_v4  ;;  %v3979_v7 = vadd.f32 %v1261_v48, %v4772_v0 }
 0x16b   : > { %v3982_v12 = vadd.f32 %v1262_v45, %v4773_v55  ;;  %v3985_v31 = vadd.f32 %v1263_v2, %v4774_v57  ;;  %v1328_v54 = vrot.slane %v1265_v25, 7  ;;  %vm1329_vm4 = vcmask 1041409  }
 0x16c   : > { %v1331_v30 = vrot.slane %v1266_v51, 6  ;;  %vm1332_vm9 = vcmask 1042434   ;;  %v1334_v1 = vrot.slane %v1267_v60, 5  ;;  %vm1335_vm12 = vcmask 1043459  }
 0x16d   : > { %v1330_v50 = vsel %vm1329_vm4, %v1328_v54, %v1264_v14  ;;  %v1337_v10 = vrot.slane %v1268_v38, 4  ;;  %vm1338_vm15 = vcmask 1044484   ;;  %v1340_v17 = vrot.slane %v1269_v24, 3 }
 0x16e   : > { %v1333_v48 = vsel %vm1332_vm9, %v1331_v30, %v1330_v50  ;;  %vm1341_vm2 = vcmask 1045509   ;;  %v1343_v62 = vrot.slane %v1270_v3, 2  ;;  %vm1344_vm0 = vcmask 1046534  }
 0x16f   : > { %v1336_v45 = vsel %vm1335_vm12, %v1334_v1, %v1333_v48  ;;  %v1346_v2 = vrot.slane %v1271_v21, 1  ;;  %vm1347_vm1 = vcmask 1047559   ;;  %v1349_v25 = vrot.slane %v1273_v32, 7 }
 0x170   : > { %v1339_v51 = vsel %vm1338_vm15, %v1337_v10, %v1336_v45  ;;  %v1351_v52 = vrot.slane %v1274_v36, 6  ;;  %v1353_v60 = vrot.slane %v1275_v27, 5  ;;  %v1355_v47 = vrot.slane %v1276_v37, 4 }
 0x171   : > { %v1342_v14 = vsel %vm1341_vm2, %v1340_v17, %v1339_v51  ;;  %v1350_v38 = vsel %vm1329_vm4, %v1349_v25, %v1272_v39  ;;  %v1357_v24 = vrot.slane %v1277_v53, 3  ;;  %v1359_v6 = vrot.slane %v3946_v33, 2 }
 0x172   : > { %v1345_v3 = vsel %vm1344_vm0, %v1343_v62, %v1342_v14  ;;  %v1352_v23 = vsel %vm1332_vm9, %v1351_v52, %v1350_v38  ;;  %v1361_v21 = vrot.slane %v3949_v11, 1  ;;  %v1363_v32 = vrot.slane %v1281_v58, 7 }
 0x173   : > { %v1348_v8 = vsel %vm1347_vm1, %v1346_v2, %v1345_v3  ;;  %v1354_v36 = vsel %vm1335_vm12, %v1353_v60, %v1352_v23  ;;  %v1365_v27 = vrot.slane %v1282_v44, 6  ;;  %v1367_v37 = vrot.slane %v1283_v19, 5 }
 0x174   : > { %v1356_v49 = vsel %vm1338_vm15, %v1355_v47, %v1354_v36  ;;  %v1364_v39 = vsel %vm1329_vm4, %v1363_v32, %v1280_v42  ;;  %v1369_v53 = vrot.slane %v3956_v61, 4  ;;  %v1371_v33 = vrot.slane %v3959_v63, 3  ;;  %1395 = vst [vmem:[%s4005_s21] sm:$0xff] %v1348_v8 }
 0x175   : > { %v1358_v11 = vsel %vm1341_vm2, %v1357_v24, %v1356_v49  ;;  %v1366_v46 = vsel %vm1332_vm9, %v1365_v27, %v1364_v39  ;;  %v1373_v15 = vrot.slane %v3962_v18, 2  ;;  %v1375_v58 = vrot.slane %v3965_v9, 1 }
 0x176   : > { %v1360_v42 = vsel %vm1344_vm0, %v1359_v6, %v1358_v11  ;;  %v1368_v59 = vsel %vm1335_vm12, %v1367_v37, %v1366_v46  ;;  %v1377_v44 = vrot.slane %v1289_v16, 7  ;;  %v1379_v41 = vrot.slane %v3970_v28, 6 }
 0x177   : > { %v1362_v19 = vsel %vm1347_vm1, %v1361_v21, %v1360_v42  ;;  %v1370_v13 = vsel %vm1338_vm15, %v1369_v53, %v1368_v59  ;;  %v1381_v61 = vrot.slane %v3973_v20, 5  ;;  %v1383_v56 = vrot.slane %v3976_v26, 4 }
 0x178   : > { %v1372_v63 = vsel %vm1341_vm2, %v1371_v33, %v1370_v13  ;;  %v1378_v35 = vsel %vm1329_vm4, %v1377_v44, %v1288_v34  ;;  %v1385_v18 = vrot.slane %v3979_v7, 3  ;;  %1396 = vst [vmem:[%s4005_s21 + $0x8] sm:$0xff] %v1362_v19  ;;  %v1387_v5 = vrot.slane %v3982_v12, 2 }
 0x179   : > { %v1374_v43 = vsel %vm1344_vm0, %v1373_v15, %v1372_v63  ;;  %v1380_v9 = vsel %vm1332_vm9, %v1379_v41, %v1378_v35  ;;  %v1389_v29 = vrot.slane %v3985_v31, 1 }
 0x17a   : > { %v1376_v22 = vsel %vm1347_vm1, %v1375_v58, %v1374_v43  ;;  %v1382_v16 = vsel %vm1335_vm12, %v1381_v61, %v1380_v9 }
 0x17b   : > { %v1384_v34 = vsel %vm1338_vm15, %v1383_v56, %v1382_v16  ;;  %1397 = vst [vmem:[%s4005_s21 + $0x10] sm:$0xff] %v1376_v22 }
 0x17c   : > { %v1386_v28 = vsel %vm1341_vm2, %v1385_v18, %v1384_v34 }
 0x17d   : > { %v1388_v40 = vsel %vm1344_vm0, %v1387_v5, %v1386_v28 }
 0x17e   : > { %v1390_v20 = vsel %vm1347_vm1, %v1389_v29, %v1388_v40 }
 0x17f   : > { %1398 = vst [vmem:[%s4005_s21 + $0x18] sm:$0xff] %v1390_v20 }
 0x180   : > { %1939 = shalt.err (!%p1936_p13)
}
 0x181   : > { %s1940_s22 = scalar_lea.hbm %s4037_s12, 512  ;;  %s1944_s24 = scalar_lea.hbm %s4094_s4, 1024 }
 0x182   : > { %p1941_p12 = scmp.ne.s32.totalorder %s4037_s12, %s1940_s22  ;;  %p1945_p5 = scmp.lt.s32.totalorder %s4037_s12, %s4094_s4 }
 0x183   : > { %p1946_p6 = scmp.lt.s32.totalorder %s1944_s24, %s1940_s22 }
 0x184   : > { %p1942_p1 = pnand %p1941_p12, %p2107_p9 }
 0x185   : > { %p1947_p8 = por %p1946_p6, %p1945_p5 }
 0x186   : > { %p1943_p2 = pneg %p1942_p1 }
 0x188   : > { %p1948_p0 = pnand %p1947_p8, %p1943_p2 }
 0x18a   : > { %1951 = shalt.err (!%p1948_p0)
}
 0x18b   : > { %s2025_s25 = smov 128   ;;  %s2026_s6 = smov 8  }
 0x18c   : > { %1611 = dma.vmem_to_hbm [thread:$0]  (%p2107_p9), %s4040_s10, 512, %s4037_s12, %s1400_s18, %s2025_s25, %s2025_s25, %s2026_s6  }
 0x18d PF: > { %s4775_s26 = sld [smem:[#allocation15_spill]]  ;;  %p4777_p3 = scmp.ge.s32.totalorder %s2014_s20, 2 }
 0x18f   : > { %p1627_p4 = pnand %p4777_p3, %p2114_p11 }
 0x191   : > { %p1628_p7 = pneg %p1627_p4 }
 0x193   : > { %s1429_s29 = sand.u32 1, %s4775_s26  }
 0x194   : > { %s1430_s21 = scalar_lea.sflag [#allocation4], %s1429_s29 }
 0x195   : > { %1989 = dma.done.wait (%p1628_p7), %s1430_s21, 512  }
 0x196   : > { %1991 = vsyncadd (%p1628_p7), %s1430_s21, 4294966784  ;;  %s26_s20 = sadd.s32 1, %s2014_s20   ;;  %s4778_s27 = sld [smem:[#allocation16_spill]] }
 0x197   : > { %p23_p10 = scmp.ge.s32.totalorder %s26_s20, 4   ;;  %s4779_s17 = sld [smem:[#allocation18_spill]] }
 0x198   : > { %s4780_s28 = sld [smem:[#allocation17_spill]]  ;;  %s4781_s15 = smov %s1998_s16 }
 0x199   : > { %s4783_s18 = smov %s2010_s19 }
 0x19a   :  { %25 = sbr.rel (!%p23_p10) target bundleno = 12 (0xc), region = 118 }
 0x19c   : > { %s4782_s16 = smov %s4778_s27 }
 0x19e   : > { %s4784_s19 = smov %s4780_s28 }
 0x19f   :  { %1435 = vsyncpa [#allocation3], 1 }
 0x1a0   :  { %1437 = vsyncpa [#allocation3 + $0x1], 1 }
 0x1a1   :  { %1438 = vsyncpa [#allocation6], 1 }
 0x1a2   :  { %1440 = vsyncpa [#allocation6 + $0x1], 1 }
 0x1a3   :  { %1441 = vsyncpa [#allocation9], 1 }
 0x1a4   :  { %1443 = vsyncpa [#allocation9 + $0x1], 1 }
 0x1a5   :  { %1444 = vsyncpa [#allocation4], 1 }
 0x1a6   :  { %1446 = vsyncpa [#allocation4 + $0x1], 1 }

</bundles_post_ra>
